<compile_context>
chip_gen: v7x
topology: tpu7x:2x2x1
jax: 0.10.0
libtpu: 0.0.40
codegen_flags: <defaults>
</compile_context>

<pallas_src>
import jax
import jax.numpy as jnp
from jax.experimental import pallas as pl
from jax.experimental.pallas import tpu as pltpu

# ----------------------------- configuration --------------------------------
B = 2            # batch
C = 32           # transformer_dim
H = W = 8        # image-embedding spatial size
N = 8            # num_mask_tokens (fixed to 8 in the module)
C1 = C // 4      # channels after first upscale conv   (= 8)
C2 = C // 8      # channels after second upscale conv  (= 4)
HW = H * W       # 64
H4, W4 = 4 * H, 4 * W
P1 = 4 * C1      # packed width after ConvT#1 (4 offsets x C1)  = 32
P2 = 16 * C2     # packed width after ConvT#2 (16 offsets x C2) = 64


# ----------------------------- in-kernel helpers -----------------------------
def _erf(x):
    # Abramowitz & Stegun 7.1.26 rational approximation (|err| < 1.5e-7).
    # Kept with the exact divide (VPU) rather than approx reciprocal to stay
    # comfortably inside the 1e-2 reference tolerance; exp goes to the EUP.
    a1, a2, a3, a4, a5 = 0.254829592, -0.284496736, 1.421413741, -1.453152027, 1.061405429
    p = 0.3275911
    z = jnp.abs(x)
    t = 1.0 / (1.0 + p * z)
    poly = t * (a1 + t * (a2 + t * (a3 + t * (a4 + t * a5))))
    y = 1.0 - poly * jnp.exp(-z * z)
    return jnp.where(x < 0.0, -y, y)


def _gelu_exact(x):
    # matches torch.nn.GELU() (erf-based, non-approximate)
    return 0.5 * x * (1.0 + _erf(x * 0.7071067811865476))


# ----------------------------- the single fused kernel -----------------------
def _fused_kernel(vals_ref, pe_ref, qproj_ref, qtok_ref, wk_ref, wv_ref,
                  mw1_ref, mb1_ref, mw2_ref, mb2_ref, mw3e_ref, mb3e_ref,
                  w1p_ref, b1p_ref, lnwp_ref, lnbp_ref, w2b_ref, b2p_ref,
                  g8_ref, selT_ref, o_ref):
    f32 = jnp.float32
    x = vals_ref[0]                                        # [HW, C]   (src, channels-last)
    keys = x + pe_ref[0]                                   # [HW, C]

    # ---- cross-attention (transformer.forward_query stand-in) ---------------
    # TODO(synk): `transformer` is an external injected module; its
    # forward_query is replaced by this deterministic single cross-attention.
    k = jnp.dot(keys, wk_ref[...], preferred_element_type=f32)        # [HW, C]
    v = jnp.dot(x, wv_ref[...], preferred_element_type=f32)           # [HW, C]
    s = jax.lax.dot_general(qproj_ref[...], k, (((1,), (1,)), ((), ())),
                            preferred_element_type=f32) * (1.0 / (C ** 0.5))  # [N, HW]
    s = s - jnp.max(s, axis=-1, keepdims=True)
    p = jnp.exp(s)
    p = p / jnp.sum(p, axis=-1, keepdims=True)
    q_emb = qtok_ref[...] + jnp.dot(p, v, preferred_element_type=f32)  # [N, C]

    # ---- hypernetwork MLP, last layer pre-expanded to the packed P2 layout --
    h = jnp.maximum(jnp.dot(q_emb, mw1_ref[...], preferred_element_type=f32)
                    + mb1_ref[...], 0.0)
    h = jnp.maximum(jnp.dot(h, mw2_ref[...], preferred_element_type=f32)
                    + mb2_ref[...], 0.0)
    qh_e = jnp.dot(h, mw3e_ref[...], preferred_element_type=f32) + mb3e_ref[...]  # [N, P2]
    qsum_e = jnp.sum(qh_e, axis=0, keepdims=True)                                  # [1, P2]

    # ---- output_upscaling (packed deconvs) -----------------------------------
    h1 = jnp.dot(x, w1p_ref[...], preferred_element_type=f32) + b1p_ref[...]       # [HW, P1]
    # grouped LayerNorm2d (per pixel, per C1 block) via group-averaging matmuls
    mu = jnp.dot(h1, g8_ref[...], preferred_element_type=f32)
    d = h1 - mu
    var = jnp.dot(d * d, g8_ref[...], preferred_element_type=f32)
    h1 = d * jax.lax.rsqrt(var + 1e-6) * lnwp_ref[...] + lnbp_ref[...]
    h1 = _gelu_exact(h1)
    h2 = jnp.dot(h1, w2b_ref[...], preferred_element_type=f32) + b2p_ref[...]      # [HW, P2]
    h2 = _gelu_exact(h2)

    # ---- masks = sum_n qh . upscaled  (token sum folded into qsum_e) ---------
    h2q = h2 * qsum_e                                                               # [HW, P2]
    masks_t = jax.lax.dot_general(selT_ref[...], h2q, (((1,), (1,)), ((), ())),
                                  preferred_element_type=f32)                       # [16, HW]
    o_ref[0] = masks_t


def fused_forward(vals, pe, q_proj, q_tokens, wk, wv,
                  mw1, mb1, mw2, mb2, mw3e, mb3e,
                  w1p, b1p, lnwp, lnbp, w2b, b2p, g8, selT):
    def _w(shape):
        n = len(shape)
        return pl.BlockSpec(shape, lambda b, n=n: (0,) * n)

    return pl.pallas_call(
        _fused_kernel,
        out_shape=jax.ShapeDtypeStruct((B, 16, HW), jnp.float32),
        grid=(B,),
        in_specs=[
            pl.BlockSpec((1, HW, C), lambda b: (b, 0, 0)),   # vals (per-batch)
            pl.BlockSpec((1, HW, C), lambda b: (0, 0, 0)),   # pe   (shared)
            _w((N, C)),            # q_proj
            _w((N, C)),            # q_tokens
            _w((C, C)),            # wk
            _w((C, C)),            # wv
            _w((C, C)),            # mlp_w1
            _w((1, C)),            # mlp_b1
            _w((C, C)),            # mlp_w2
            _w((1, C)),            # mlp_b2
            _w((C, P2)),           # mlp_w3 expanded
            _w((1, P2)),           # mlp_b3 expanded
            _w((C, P1)),           # packed ConvT#1 weight
            _w((1, P1)),           # packed ConvT#1 bias
            _w((1, P1)),           # packed LN weight
            _w((1, P1)),           # packed LN bias
            _w((P1, P2)),          # block-diag packed ConvT#2 weight
            _w((1, P2)),           # packed ConvT#2 bias
            _w((P1, P1)),          # group-average matrix
            _w((16, P2)),          # selection/fold matrix (transposed)
        ],
        out_specs=pl.BlockSpec((1, 16, HW), lambda b: (b, 0, 0)),
        compiler_params=pltpu.CompilerParams(dimension_semantics=("parallel",)),
    )(vals, pe, q_proj, q_tokens, wk, wv, mw1, mb1, mw2, mb2, mw3e, mb3e,
      w1p, b1p, lnwp, lnbp, w2b, b2p, g8, selT)


# ----------------------------- full forward ----------------------------------
def mask_decoder_forward(params, image_embeddings, image_pe,
                         sparse_prompt_embeddings, dense_prompt_embeddings):
    # image_embeddings / dense_prompt_embeddings : [B, C, H, W] (NCHW)
    # image_pe                                   : [1, C, H, W]
    # sparse_prompt_embeddings is accepted but unused, matching the reference forward.
    del sparse_prompt_embeddings
    f32 = jnp.float32

    src = image_embeddings + dense_prompt_embeddings
    vals = jnp.transpose(src, (0, 2, 3, 1)).reshape(B, HW, C)          # channels-last
    pe = jnp.transpose(image_pe, (0, 2, 3, 1)).reshape(1, HW, C)

    # ---- tiny parameter packing (XLA, once per call) ----
    q_proj = params["query_tokens"] @ params["wq"]                     # hoisted (batch-invariant)

    # ConvT#1: W1p[ci, d1*C1 + co] = w1[ci, co, d1i, d1j],  d1 = 2*d1i + d1j
    w1p = jnp.transpose(params["up_w1"], (0, 2, 3, 1)).reshape(C, P1)
    b1p = jnp.tile(params["up_b1"], 4)[None, :]
    lnwp = jnp.tile(params["ln_w"], 4)[None, :]
    lnbp = jnp.tile(params["ln_b"], 4)[None, :]

    # ConvT#2: block-diagonal W2big[d1*C1+ci, d1*16 + d2*C2 + co] = w2[ci, co, d2i, d2j]
    w2p = jnp.transpose(params["up_w2"], (2, 3, 0, 1)).reshape(4, C1, C2)   # [d2, ci, co]
    w2inner = jnp.transpose(w2p, (1, 0, 2)).reshape(C1, 4 * C2)             # [ci, d2*C2+co]
    w2b = jnp.kron(jnp.eye(4, dtype=f32), w2inner)                          # [P1, P2]
    b2p = jnp.tile(params["up_b2"], 16)[None, :]

    # expand last MLP layer to packed P2 lanes: Texp[c, k] = 1 iff k % C2 == c
    kk = jnp.arange(P2)
    texp = (jnp.arange(C2)[:, None] == (kk[None, :] % C2)).astype(f32)      # [C2, P2]
    mw3e = params["mlp_w3"] @ texp
    mb3e = params["mlp_b3"][None, :] @ texp

    # grouped-LN averaging matrix and channel-fold selection matrix (constants)
    idx = jnp.arange(P1)
    g8 = ((idx[:, None] // C1) == (idx[None, :] // C1)).astype(f32) / C1    # [P1, P1]
    selT = (jnp.arange(16)[:, None] == (kk[None, :] // C2)).astype(f32)     # [16, P2]

    o = fused_forward(vals, pe, q_proj, params["query_tokens"],
                      params["wk"], params["wv"],
                      params["mlp_w1"], params["mlp_b1"][None, :],
                      params["mlp_w2"], params["mlp_b2"][None, :],
                      mw3e, mb3e, w1p, b1p, lnwp, lnbp, w2b, b2p, g8, selT)  # [B, 16, HW]

    # final spatial interleave applied to the small scalar map only (8 KiB):
    # o[b, (d1i,d1j,d2i,d2j), (i,j)]  ->  masks[b, 1, 4i+2*d1i+d2i, 4j+2*d1j+d2j]
    m = o.reshape(B, 2, 2, 2, 2, H, W)
    m = jnp.transpose(m, (0, 5, 1, 3, 6, 2, 4)).reshape(B, 1, H4, W4)
    return m, 0


# ----------------------------- parameters ------------------------------------
def init_params(key):
    ks = jax.random.split(key, 16)

    def rn(k, shape, scale=1.0):
        return (scale * jax.random.normal(k, shape, jnp.float32)).astype(jnp.float32)

    return dict(
        query_tokens=rn(ks[0], (N, C), 1.0),
        wq=rn(ks[1], (C, C), C ** -0.5),
        wk=rn(ks[2], (C, C), C ** -0.5),
        wv=rn(ks[3], (C, C), C ** -0.5),
        # ConvTranspose2d weights, PyTorch layout [Cin, Cout, kH, kW]
        up_w1=rn(ks[4], (C, C1, 2, 2), (C * 4) ** -0.5),
        up_b1=rn(ks[6], (C1,), 0.02),
        ln_w=1.0 + rn(ks[7], (C1,), 0.02),
        ln_b=rn(ks[8], (C1,), 0.02),
        up_w2=rn(ks[5], (C1, C2, 2, 2), (C1 * 4) ** -0.5),
        up_b2=rn(ks[9], (C2,), 0.02),
        mlp_w1=rn(ks[10], (C, C), C ** -0.5),
        mlp_b1=rn(ks[11], (C,), 0.02),
        mlp_w2=rn(ks[12], (C, C), C ** -0.5),
        mlp_b2=rn(ks[13], (C,), 0.02),
        mlp_w3=rn(ks[14], (C, C2), C ** -0.5),
        mlp_b3=rn(ks[15], (C2,), 0.02),
    )


# ----------------------------- plain-JAX reference ---------------------------
def reference_forward(params, image_embeddings, image_pe, sparse, dense):
    del sparse
    src = image_embeddings + dense
    src_nhwc = jnp.transpose(src, (0, 2, 3, 1))
    keys = (src_nhwc + jnp.transpose(image_pe, (0, 2, 3, 1))).reshape(B, HW, C)
    vals = src_nhwc.reshape(B, HW, C)

    q = params["query_tokens"] @ params["wq"]
    k = keys @ params["wk"]
    v = vals @ params["wv"]
    s = jnp.einsum("nc,bkc->bnk", q, k) / (C ** 0.5)
    p = jax.nn.softmax(s, axis=-1)
    q_emb = params["query_tokens"][None] + jnp.einsum("bnk,bkc->bnc", p, v)

    # output_upscaling: ConvT(2,2) -> LayerNorm2d -> GELU -> ConvT(2,2) -> GELU
    h1 = jnp.einsum("bhwc,coxy->bhwxyo", src_nhwc, params["up_w1"]) + params["up_b1"]
    mu = jnp.mean(h1, axis=-1, keepdims=True)
    var = jnp.mean((h1 - mu) ** 2, axis=-1, keepdims=True)
    h1 = (h1 - mu) / jnp.sqrt(var + 1e-6) * params["ln_w"] + params["ln_b"]
    h1 = jax.nn.gelu(h1, approximate=False)
    h2 = jnp.einsum("bhwxyo,opuv->bhwxyuvp", h1, params["up_w2"]) + params["up_b2"]
    h2 = jax.nn.gelu(h2, approximate=False)
    up = jnp.transpose(h2, (0, 1, 3, 5, 2, 4, 6, 7)).reshape(B, H4, W4, C2)

    qh = jnp.maximum(q_emb @ params["mlp_w1"] + params["mlp_b1"], 0.0)
    qh = jnp.maximum(qh @ params["mlp_w2"] + params["mlp_b2"], 0.0)
    qh = qh @ params["mlp_w3"] + params["mlp_b3"]

    masks = jnp.einsum("bnc,bijc->bij", qh, up)     # sums over tokens and channels
    return masks[:, None], 0


# ----------------------------- main -------------------------------------------
if __name__ == "__main__":
    key = jax.random.PRNGKey(0)
    k_img, k_pe, k_sparse, k_dense, k_par = jax.random.split(key, 5)

    image_embeddings = jax.random.normal(k_img, (B, C, H, W), jnp.float32)
    image_pe = jax.random.normal(k_pe, (1, C, H, W), jnp.float32)
    sparse_prompt_embeddings = jax.random.normal(k_sparse, (B, 5, C), jnp.float32)
    dense_prompt_embeddings = jax.random.normal(k_dense, (B, C, H, W), jnp.float32)

    params = init_params(k_par)

    masks, iou = jax.jit(mask_decoder_forward)(
        params, image_embeddings, image_pe,
        sparse_prompt_embeddings, dense_prompt_embeddings)
    masks = jax.block_until_ready(masks)
    assert masks.shape == (B, 1, H4, W4), masks.shape

    ref_masks, _ = reference_forward(
        params, image_embeddings, image_pe,
        sparse_prompt_embeddings, dense_prompt_embeddings)
    max_err = float(jnp.max(jnp.abs(masks - ref_masks)))
    assert max_err < 1e-2, f"mismatch vs reference: {max_err}"

    print("KERNEL_OK")
</pallas_src>

<mosaic_0001>
module attributes {stable_mosaic.version = 11 : i64} {
  func.func @_fused_kernel(%arg0: i32, %arg1: memref<1x64x32xf32, #tpu.memory_space<vmem>>, %arg2: memref<1x64x32xf32, #tpu.memory_space<vmem>>, %arg3: memref<8x32xf32, #tpu.memory_space<vmem>>, %arg4: memref<8x32xf32, #tpu.memory_space<vmem>>, %arg5: memref<32x32xf32, #tpu.memory_space<vmem>>, %arg6: memref<32x32xf32, #tpu.memory_space<vmem>>, %arg7: memref<32x32xf32, #tpu.memory_space<vmem>>, %arg8: memref<1x32xf32, #tpu.memory_space<vmem>>, %arg9: memref<32x32xf32, #tpu.memory_space<vmem>>, %arg10: memref<1x32xf32, #tpu.memory_space<vmem>>, %arg11: memref<32x64xf32, #tpu.memory_space<vmem>>, %arg12: memref<1x64xf32, #tpu.memory_space<vmem>>, %arg13: memref<32x32xf32, #tpu.memory_space<vmem>>, %arg14: memref<1x32xf32, #tpu.memory_space<vmem>>, %arg15: memref<1x32xf32, #tpu.memory_space<vmem>>, %arg16: memref<1x32xf32, #tpu.memory_space<vmem>>, %arg17: memref<32x64xf32, #tpu.memory_space<vmem>>, %arg18: memref<1x64xf32, #tpu.memory_space<vmem>>, %arg19: memref<32x32xf32, #tpu.memory_space<vmem>>, %arg20: memref<16x64xf32, #tpu.memory_space<vmem>>, %arg21: memref<1x16x64xf32, #tpu.memory_space<vmem>>) attributes {dimension_semantics = [#tpu.dimension_semantics<parallel>], iteration_bounds = array<i64: 2>, scalar_prefetch = 0 : i64, scratch_operands = 0 : i64, tpu.core_type = #tpu.core_type<tc>, window_params = [{transform_indices = @transform_0, window_bounds = array<i64: 1, 64, 32>}, {pipeline_mode = #tpu.pipeline_mode<synchronous>, transform_indices = @transform_1, window_bounds = array<i64: 1, 64, 32>}, {pipeline_mode = #tpu.pipeline_mode<synchronous>, transform_indices = @transform_2, window_bounds = array<i64: 8, 32>}, {pipeline_mode = #tpu.pipeline_mode<synchronous>, transform_indices = @transform_3, window_bounds = array<i64: 8, 32>}, {pipeline_mode = #tpu.pipeline_mode<synchronous>, transform_indices = @transform_4, window_bounds = array<i64: 32, 32>}, {pipeline_mode = #tpu.pipeline_mode<synchronous>, transform_indices = @transform_5, window_bounds = array<i64: 32, 32>}, {pipeline_mode = #tpu.pipeline_mode<synchronous>, transform_indices = @transform_6, window_bounds = array<i64: 32, 32>}, {pipeline_mode = #tpu.pipeline_mode<synchronous>, transform_indices = @transform_7, window_bounds = array<i64: 1, 32>}, {pipeline_mode = #tpu.pipeline_mode<synchronous>, transform_indices = @transform_8, window_bounds = array<i64: 32, 32>}, {pipeline_mode = #tpu.pipeline_mode<synchronous>, transform_indices = @transform_9, window_bounds = array<i64: 1, 32>}, {pipeline_mode = #tpu.pipeline_mode<synchronous>, transform_indices = @transform_10, window_bounds = array<i64: 32, 64>}, {pipeline_mode = #tpu.pipeline_mode<synchronous>, transform_indices = @transform_11, window_bounds = array<i64: 1, 64>}, {pipeline_mode = #tpu.pipeline_mode<synchronous>, transform_indices = @transform_12, window_bounds = array<i64: 32, 32>}, {pipeline_mode = #tpu.pipeline_mode<synchronous>, transform_indices = @transform_13, window_bounds = array<i64: 1, 32>}, {pipeline_mode = #tpu.pipeline_mode<synchronous>, transform_indices = @transform_14, window_bounds = array<i64: 1, 32>}, {pipeline_mode = #tpu.pipeline_mode<synchronous>, transform_indices = @transform_15, window_bounds = array<i64: 1, 32>}, {pipeline_mode = #tpu.pipeline_mode<synchronous>, transform_indices = @transform_16, window_bounds = array<i64: 32, 64>}, {pipeline_mode = #tpu.pipeline_mode<synchronous>, transform_indices = @transform_17, window_bounds = array<i64: 1, 64>}, {pipeline_mode = #tpu.pipeline_mode<synchronous>, transform_indices = @transform_18, window_bounds = array<i64: 32, 32>}, {pipeline_mode = #tpu.pipeline_mode<synchronous>, transform_indices = @transform_19, window_bounds = array<i64: 16, 64>}, {transform_indices = @transform_20, window_bounds = array<i64: 1, 16, 64>}]} {
    %c0 = arith.constant 0 : index
    %c0_0 = arith.constant 0 : index
    %c0_1 = arith.constant 0 : index
    %0 = vector.load %arg1[%c0, %c0_0, %c0_1] : memref<1x64x32xf32, #tpu.memory_space<vmem>>, vector<1x64x32xf32>
    %1 = vector.shape_cast %0 : vector<1x64x32xf32> to vector<64x32xf32>
    %c0_2 = arith.constant 0 : index
    %c0_3 = arith.constant 0 : index
    %c0_4 = arith.constant 0 : index
    %2 = vector.load %arg2[%c0_2, %c0_3, %c0_4] : memref<1x64x32xf32, #tpu.memory_space<vmem>>, vector<1x64x32xf32>
    %3 = vector.shape_cast %2 : vector<1x64x32xf32> to vector<64x32xf32>
    %4 = arith.addf %1, %3 : vector<64x32xf32>
    %c0_5 = arith.constant 0 : index
    %c0_6 = arith.constant 0 : index
    %5 = vector.load %arg5[%c0_5, %c0_6] : memref<32x32xf32, #tpu.memory_space<vmem>>, vector<32x32xf32>
    %cst = arith.constant dense<0.000000e+00> : vector<64x32xf32>
    %6 = tpu.matmul %4, %5, %cst {dimension_numbers = #tpu.dot_dimension_numbers<[1], [0], [0], [1], [0, 0, 1, 1], [], []>} : vector<64x32xf32>, vector<32x32xf32>, vector<64x32xf32> -> vector<64x32xf32>
    %c0_7 = arith.constant 0 : index
    %c0_8 = arith.constant 0 : index
    %7 = vector.load %arg6[%c0_7, %c0_8] : memref<32x32xf32, #tpu.memory_space<vmem>>, vector<32x32xf32>
    %cst_9 = arith.constant dense<0.000000e+00> : vector<64x32xf32>
    %8 = tpu.matmul %1, %7, %cst_9 {dimension_numbers = #tpu.dot_dimension_numbers<[1], [0], [0], [1], [0, 0, 1, 1], [], []>} : vector<64x32xf32>, vector<32x32xf32>, vector<64x32xf32> -> vector<64x32xf32>
    %c0_10 = arith.constant 0 : index
    %c0_11 = arith.constant 0 : index
    %9 = vector.load %arg3[%c0_10, %c0_11] : memref<8x32xf32, #tpu.memory_space<vmem>>, vector<8x32xf32>
    %cst_12 = arith.constant dense<0.000000e+00> : vector<8x64xf32>
    %10 = tpu.matmul %9, %6, %cst_12 {dimension_numbers = #tpu.dot_dimension_numbers<[1], [1], [0], [0], [0, 0, 1, 0], [], []>} : vector<8x32xf32>, vector<64x32xf32>, vector<8x64xf32> -> vector<8x64xf32>
    %cst_13 = arith.constant 0.176776692 : f32
    %11 = vector.broadcast %cst_13 : f32 to vector<8x64xf32>
    %12 = arith.mulf %10, %11 : vector<8x64xf32>
    %cst_14 = arith.constant dense<0xFF800000> : vector<8xf32>
    %13 = vector.multi_reduction <maximumf>, %12, %cst_14 [1] : vector<8x64xf32> to vector<8xf32>
    %14 = vector.shape_cast %13 : vector<8xf32> to vector<8x1xf32>
    %15 = vector.broadcast %14 : vector<8x1xf32> to vector<8x64xf32>
    %16 = arith.subf %12, %15 : vector<8x64xf32>
    %17 = math.exp %16 : vector<8x64xf32>
    %cst_15 = arith.constant dense<0.000000e+00> : vector<8xf32>
    %18 = vector.multi_reduction <add>, %17, %cst_15 [1] : vector<8x64xf32> to vector<8xf32>
    %19 = vector.shape_cast %18 : vector<8xf32> to vector<8x1xf32>
    %20 = vector.broadcast %19 : vector<8x1xf32> to vector<8x64xf32>
    %21 = arith.divf %17, %20 : vector<8x64xf32>
    %c0_16 = arith.constant 0 : index
    %c0_17 = arith.constant 0 : index
    %22 = vector.load %arg4[%c0_16, %c0_17] : memref<8x32xf32, #tpu.memory_space<vmem>>, vector<8x32xf32>
    %cst_18 = arith.constant dense<0.000000e+00> : vector<8x32xf32>
    %23 = tpu.matmul %21, %8, %cst_18 {dimension_numbers = #tpu.dot_dimension_numbers<[1], [0], [0], [1], [0, 0, 1, 1], [], []>} : vector<8x64xf32>, vector<64x32xf32>, vector<8x32xf32> -> vector<8x32xf32>
    %24 = arith.addf %22, %23 : vector<8x32xf32>
    %c0_19 = arith.constant 0 : index
    %c0_20 = arith.constant 0 : index
    %25 = vector.load %arg7[%c0_19, %c0_20] : memref<32x32xf32, #tpu.memory_space<vmem>>, vector<32x32xf32>
    %cst_21 = arith.constant dense<0.000000e+00> : vector<8x32xf32>
    %26 = tpu.matmul %24, %25, %cst_21 {dimension_numbers = #tpu.dot_dimension_numbers<[1], [0], [0], [1], [0, 0, 1, 1], [], []>} : vector<8x32xf32>, vector<32x32xf32>, vector<8x32xf32> -> vector<8x32xf32>
    %c0_22 = arith.constant 0 : index
    %c0_23 = arith.constant 0 : index
    %27 = vector.load %arg8[%c0_22, %c0_23] : memref<1x32xf32, #tpu.memory_space<vmem>>, vector<1x32xf32>
    %28 = vector.broadcast %27 : vector<1x32xf32> to vector<8x32xf32>
    %29 = arith.addf %26, %28 : vector<8x32xf32>
    %cst_24 = arith.constant 0.000000e+00 : f32
    %30 = vector.broadcast %cst_24 : f32 to vector<8x32xf32>
    %31 = arith.maximumf %29, %30 : vector<8x32xf32>
    %c0_25 = arith.constant 0 : index
    %c0_26 = arith.constant 0 : index
    %32 = vector.load %arg9[%c0_25, %c0_26] : memref<32x32xf32, #tpu.memory_space<vmem>>, vector<32x32xf32>
    %cst_27 = arith.constant dense<0.000000e+00> : vector<8x32xf32>
    %33 = tpu.matmul %31, %32, %cst_27 {dimension_numbers = #tpu.dot_dimension_numbers<[1], [0], [0], [1], [0, 0, 1, 1], [], []>} : vector<8x32xf32>, vector<32x32xf32>, vector<8x32xf32> -> vector<8x32xf32>
    %c0_28 = arith.constant 0 : index
    %c0_29 = arith.constant 0 : index
    %34 = vector.load %arg10[%c0_28, %c0_29] : memref<1x32xf32, #tpu.memory_space<vmem>>, vector<1x32xf32>
    %35 = vector.broadcast %34 : vector<1x32xf32> to vector<8x32xf32>
    %36 = arith.addf %33, %35 : vector<8x32xf32>
    %cst_30 = arith.constant 0.000000e+00 : f32
    %37 = vector.broadcast %cst_30 : f32 to vector<8x32xf32>
    %38 = arith.maximumf %36, %37 : vector<8x32xf32>
    %c0_31 = arith.constant 0 : index
    %c0_32 = arith.constant 0 : index
    %39 = vector.load %arg11[%c0_31, %c0_32] : memref<32x64xf32, #tpu.memory_space<vmem>>, vector<32x64xf32>
    %cst_33 = arith.constant dense<0.000000e+00> : vector<8x64xf32>
    %40 = tpu.matmul %38, %39, %cst_33 {dimension_numbers = #tpu.dot_dimension_numbers<[1], [0], [0], [1], [0, 0, 1, 1], [], []>} : vector<8x32xf32>, vector<32x64xf32>, vector<8x64xf32> -> vector<8x64xf32>
    %c0_34 = arith.constant 0 : index
    %c0_35 = arith.constant 0 : index
    %41 = vector.load %arg12[%c0_34, %c0_35] : memref<1x64xf32, #tpu.memory_space<vmem>>, vector<1x64xf32>
    %42 = vector.broadcast %41 : vector<1x64xf32> to vector<8x64xf32>
    %43 = arith.addf %40, %42 : vector<8x64xf32>
    %cst_36 = arith.constant dense<0.000000e+00> : vector<64xf32>
    %44 = vector.multi_reduction <add>, %43, %cst_36 [0] : vector<8x64xf32> to vector<64xf32>
    %45 = vector.shape_cast %44 : vector<64xf32> to vector<1x64xf32>
    %c0_37 = arith.constant 0 : index
    %c0_38 = arith.constant 0 : index
    %46 = vector.load %arg13[%c0_37, %c0_38] : memref<32x32xf32, #tpu.memory_space<vmem>>, vector<32x32xf32>
    %cst_39 = arith.constant dense<0.000000e+00> : vector<64x32xf32>
    %47 = tpu.matmul %1, %46, %cst_39 {dimension_numbers = #tpu.dot_dimension_numbers<[1], [0], [0], [1], [0, 0, 1, 1], [], []>} : vector<64x32xf32>, vector<32x32xf32>, vector<64x32xf32> -> vector<64x32xf32>
    %c0_40 = arith.constant 0 : index
    %c0_41 = arith.constant 0 : index
    %48 = vector.load %arg14[%c0_40, %c0_41] : memref<1x32xf32, #tpu.memory_space<vmem>>, vector<1x32xf32>
    %49 = vector.broadcast %48 : vector<1x32xf32> to vector<64x32xf32>
    %50 = arith.addf %47, %49 : vector<64x32xf32>
    %c0_42 = arith.constant 0 : index
    %c0_43 = arith.constant 0 : index
    %51 = vector.load %arg19[%c0_42, %c0_43] : memref<32x32xf32, #tpu.memory_space<vmem>>, vector<32x32xf32>
    %cst_44 = arith.constant dense<0.000000e+00> : vector<64x32xf32>
    %52 = tpu.matmul %50, %51, %cst_44 {dimension_numbers = #tpu.dot_dimension_numbers<[1], [0], [0], [1], [0, 0, 1, 1], [], []>} : vector<64x32xf32>, vector<32x32xf32>, vector<64x32xf32> -> vector<64x32xf32>
    %53 = arith.subf %50, %52 : vector<64x32xf32>
    %54 = arith.mulf %53, %53 : vector<64x32xf32>
    %c0_45 = arith.constant 0 : index
    %c0_46 = arith.constant 0 : index
    %55 = vector.load %arg19[%c0_45, %c0_46] : memref<32x32xf32, #tpu.memory_space<vmem>>, vector<32x32xf32>
    %cst_47 = arith.constant dense<0.000000e+00> : vector<64x32xf32>
    %56 = tpu.matmul %54, %55, %cst_47 {dimension_numbers = #tpu.dot_dimension_numbers<[1], [0], [0], [1], [0, 0, 1, 1], [], []>} : vector<64x32xf32>, vector<32x32xf32>, vector<64x32xf32> -> vector<64x32xf32>
    %cst_48 = arith.constant 9.99999997E-7 : f32
    %57 = vector.broadcast %cst_48 : f32 to vector<64x32xf32>
    %58 = arith.addf %56, %57 : vector<64x32xf32>
    %59 = math.rsqrt %58 : vector<64x32xf32>
    %60 = arith.mulf %53, %59 : vector<64x32xf32>
    %c0_49 = arith.constant 0 : index
    %c0_50 = arith.constant 0 : index
    %61 = vector.load %arg15[%c0_49, %c0_50] : memref<1x32xf32, #tpu.memory_space<vmem>>, vector<1x32xf32>
    %62 = vector.broadcast %61 : vector<1x32xf32> to vector<64x32xf32>
    %63 = arith.mulf %60, %62 : vector<64x32xf32>
    %c0_51 = arith.constant 0 : index
    %c0_52 = arith.constant 0 : index
    %64 = vector.load %arg16[%c0_51, %c0_52] : memref<1x32xf32, #tpu.memory_space<vmem>>, vector<1x32xf32>
    %65 = vector.broadcast %64 : vector<1x32xf32> to vector<64x32xf32>
    %66 = arith.addf %63, %65 : vector<64x32xf32>
    %cst_53 = arith.constant 5.000000e-01 : f32
    %67 = vector.broadcast %cst_53 : f32 to vector<64x32xf32>
    %68 = arith.mulf %67, %66 : vector<64x32xf32>
    %cst_54 = arith.constant 0.707106769 : f32
    %69 = vector.broadcast %cst_54 : f32 to vector<64x32xf32>
    %70 = arith.mulf %66, %69 : vector<64x32xf32>
    %71 = math.absf %70 : vector<64x32xf32>
    %cst_55 = arith.constant 0.327591091 : f32
    %72 = vector.broadcast %cst_55 : f32 to vector<64x32xf32>
    %73 = arith.mulf %72, %71 : vector<64x32xf32>
    %cst_56 = arith.constant 1.000000e+00 : f32
    %74 = vector.broadcast %cst_56 : f32 to vector<64x32xf32>
    %75 = arith.addf %74, %73 : vector<64x32xf32>
    %cst_57 = arith.constant 1.000000e+00 : f32
    %76 = vector.broadcast %cst_57 : f32 to vector<64x32xf32>
    %77 = arith.divf %76, %75 : vector<64x32xf32>
    %cst_58 = arith.constant 1.06140542 : f32
    %78 = vector.broadcast %cst_58 : f32 to vector<64x32xf32>
    %79 = arith.mulf %77, %78 : vector<64x32xf32>
    %cst_59 = arith.constant -1.45315206 : f32
    %80 = vector.broadcast %cst_59 : f32 to vector<64x32xf32>
    %81 = arith.addf %80, %79 : vector<64x32xf32>
    %82 = arith.mulf %77, %81 : vector<64x32xf32>
    %cst_60 = arith.constant 1.42141378 : f32
    %83 = vector.broadcast %cst_60 : f32 to vector<64x32xf32>
    %84 = arith.addf %83, %82 : vector<64x32xf32>
    %85 = arith.mulf %77, %84 : vector<64x32xf32>
    %cst_61 = arith.constant -0.284496725 : f32
    %86 = vector.broadcast %cst_61 : f32 to vector<64x32xf32>
    %87 = arith.addf %86, %85 : vector<64x32xf32>
    %88 = arith.mulf %77, %87 : vector<64x32xf32>
    %cst_62 = arith.constant 0.254829586 : f32
    %89 = vector.broadcast %cst_62 : f32 to vector<64x32xf32>
    %90 = arith.addf %89, %88 : vector<64x32xf32>
    %91 = arith.mulf %77, %90 : vector<64x32xf32>
    %cst_63 = arith.constant 0.000000e+00 : f32
    %92 = vector.broadcast %cst_63 : f32 to vector<64x32xf32>
    %93 = arith.subf %92, %71 : vector<64x32xf32>
    %94 = arith.mulf %93, %71 : vector<64x32xf32>
    %95 = math.exp %94 : vector<64x32xf32>
    %96 = arith.mulf %91, %95 : vector<64x32xf32>
    %cst_64 = arith.constant 1.000000e+00 : f32
    %97 = vector.broadcast %cst_64 : f32 to vector<64x32xf32>
    %98 = arith.subf %97, %96 : vector<64x32xf32>
    %cst_65 = arith.constant 0.000000e+00 : f32
    %99 = vector.broadcast %cst_65 : f32 to vector<64x32xf32>
    %100 = arith.cmpf olt, %70, %99 : vector<64x32xf32>
    %cst_66 = arith.constant 0.000000e+00 : f32
    %101 = vector.broadcast %cst_66 : f32 to vector<64x32xf32>
    %102 = arith.subf %101, %98 : vector<64x32xf32>
    %103 = arith.select %100, %102, %98 : vector<64x32xi1>, vector<64x32xf32>
    %cst_67 = arith.constant 1.000000e+00 : f32
    %104 = vector.broadcast %cst_67 : f32 to vector<64x32xf32>
    %105 = arith.addf %104, %103 : vector<64x32xf32>
    %106 = arith.mulf %68, %105 : vector<64x32xf32>
    %c0_68 = arith.constant 0 : index
    %c0_69 = arith.constant 0 : index
    %107 = vector.load %arg17[%c0_68, %c0_69] : memref<32x64xf32, #tpu.memory_space<vmem>>, vector<32x64xf32>
    %cst_70 = arith.constant dense<0.000000e+00> : vector<64x64xf32>
    %108 = tpu.matmul %106, %107, %cst_70 {dimension_numbers = #tpu.dot_dimension_numbers<[1], [0], [0], [1], [0, 0, 1, 1], [], []>} : vector<64x32xf32>, vector<32x64xf32>, vector<64x64xf32> -> vector<64x64xf32>
    %c0_71 = arith.constant 0 : index
    %c0_72 = arith.constant 0 : index
    %109 = vector.load %arg18[%c0_71, %c0_72] : memref<1x64xf32, #tpu.memory_space<vmem>>, vector<1x64xf32>
    %110 = vector.broadcast %109 : vector<1x64xf32> to vector<64x64xf32>
    %111 = arith.addf %108, %110 : vector<64x64xf32>
    %cst_73 = arith.constant 5.000000e-01 : f32
    %112 = vector.broadcast %cst_73 : f32 to vector<64x64xf32>
    %113 = arith.mulf %112, %111 : vector<64x64xf32>
    %cst_74 = arith.constant 0.707106769 : f32
    %114 = vector.broadcast %cst_74 : f32 to vector<64x64xf32>
    %115 = arith.mulf %111, %114 : vector<64x64xf32>
    %116 = math.absf %115 : vector<64x64xf32>
    %cst_75 = arith.constant 0.327591091 : f32
    %117 = vector.broadcast %cst_75 : f32 to vector<64x64xf32>
    %118 = arith.mulf %117, %116 : vector<64x64xf32>
    %cst_76 = arith.constant 1.000000e+00 : f32
    %119 = vector.broadcast %cst_76 : f32 to vector<64x64xf32>
    %120 = arith.addf %119, %118 : vector<64x64xf32>
    %cst_77 = arith.constant 1.000000e+00 : f32
    %121 = vector.broadcast %cst_77 : f32 to vector<64x64xf32>
    %122 = arith.divf %121, %120 : vector<64x64xf32>
    %cst_78 = arith.constant 1.06140542 : f32
    %123 = vector.broadcast %cst_78 : f32 to vector<64x64xf32>
    %124 = arith.mulf %122, %123 : vector<64x64xf32>
    %cst_79 = arith.constant -1.45315206 : f32
    %125 = vector.broadcast %cst_79 : f32 to vector<64x64xf32>
    %126 = arith.addf %125, %124 : vector<64x64xf32>
    %127 = arith.mulf %122, %126 : vector<64x64xf32>
    %cst_80 = arith.constant 1.42141378 : f32
    %128 = vector.broadcast %cst_80 : f32 to vector<64x64xf32>
    %129 = arith.addf %128, %127 : vector<64x64xf32>
    %130 = arith.mulf %122, %129 : vector<64x64xf32>
    %cst_81 = arith.constant -0.284496725 : f32
    %131 = vector.broadcast %cst_81 : f32 to vector<64x64xf32>
    %132 = arith.addf %131, %130 : vector<64x64xf32>
    %133 = arith.mulf %122, %132 : vector<64x64xf32>
    %cst_82 = arith.constant 0.254829586 : f32
    %134 = vector.broadcast %cst_82 : f32 to vector<64x64xf32>
    %135 = arith.addf %134, %133 : vector<64x64xf32>
    %136 = arith.mulf %122, %135 : vector<64x64xf32>
    %cst_83 = arith.constant 0.000000e+00 : f32
    %137 = vector.broadcast %cst_83 : f32 to vector<64x64xf32>
    %138 = arith.subf %137, %116 : vector<64x64xf32>
    %139 = arith.mulf %138, %116 : vector<64x64xf32>
    %140 = math.exp %139 : vector<64x64xf32>
    %141 = arith.mulf %136, %140 : vector<64x64xf32>
    %cst_84 = arith.constant 1.000000e+00 : f32
    %142 = vector.broadcast %cst_84 : f32 to vector<64x64xf32>
    %143 = arith.subf %142, %141 : vector<64x64xf32>
    %cst_85 = arith.constant 0.000000e+00 : f32
    %144 = vector.broadcast %cst_85 : f32 to vector<64x64xf32>
    %145 = arith.cmpf olt, %115, %144 : vector<64x64xf32>
    %cst_86 = arith.constant 0.000000e+00 : f32
    %146 = vector.broadcast %cst_86 : f32 to vector<64x64xf32>
    %147 = arith.subf %146, %143 : vector<64x64xf32>
    %148 = arith.select %145, %147, %143 : vector<64x64xi1>, vector<64x64xf32>
    %cst_87 = arith.constant 1.000000e+00 : f32
    %149 = vector.broadcast %cst_87 : f32 to vector<64x64xf32>
    %150 = arith.addf %149, %148 : vector<64x64xf32>
    %151 = arith.mulf %113, %150 : vector<64x64xf32>
    %152 = vector.broadcast %45 : vector<1x64xf32> to vector<64x64xf32>
    %153 = arith.mulf %151, %152 : vector<64x64xf32>
    %c0_88 = arith.constant 0 : index
    %c0_89 = arith.constant 0 : index
    %154 = vector.load %arg20[%c0_88, %c0_89] : memref<16x64xf32, #tpu.memory_space<vmem>>, vector<16x64xf32>
    %cst_90 = arith.constant dense<0.000000e+00> : vector<16x64xf32>
    %155 = tpu.matmul %154, %153, %cst_90 {dimension_numbers = #tpu.dot_dimension_numbers<[1], [1], [0], [0], [0, 0, 1, 0], [], []>} : vector<16x64xf32>, vector<64x64xf32>, vector<16x64xf32> -> vector<16x64xf32>
    %c0_91 = arith.constant 0 : index
    %c0_92 = arith.constant 0 : index
    %c0_93 = arith.constant 0 : index
    %156 = vector.load %arg21[%c0_91, %c0_92, %c0_93] : memref<1x16x64xf32, #tpu.memory_space<vmem>>, vector<1x16x64xf32>
    %157 = vector.shape_cast %156 : vector<1x16x64xf32> to vector<16x64xf32>
    %158 = vector.shape_cast %155 : vector<16x64xf32> to vector<1x16x64xf32>
    tpu.vector_store %arg21[%c0_91, %c0_92, %c0_93], %158 {strides = array<i32>} : memref<1x16x64xf32, #tpu.memory_space<vmem>>, vector<1x16x64xf32>,
    return
  }
  func.func @transform_0(%arg0: i32) -> (i32, i32, i32) {
    %c0_i32 = arith.constant 0 : i32
    %c0_i32_0 = arith.constant 0 : i32
    %c0_i32_1 = arith.constant 0 : i32
    return %arg0, %c0_i32, %c0_i32_0 : i32, i32, i32
  }
  func.func @transform_1(%arg0: i32) -> (i32, i32, i32) {
    %c0_i32 = arith.constant 0 : i32
    %c0_i32_0 = arith.constant 0 : i32
    %c0_i32_1 = arith.constant 0 : i32
    %c0_i32_2 = arith.constant 0 : i32
    return %c0_i32, %c0_i32_0, %c0_i32_1 : i32, i32, i32
  }
  func.func @transform_2(%arg0: i32) -> (i32, i32) {
    %c0_i32 = arith.constant 0 : i32
    %c0_i32_0 = arith.constant 0 : i32
    %c0_i32_1 = arith.constant 0 : i32
    return %c0_i32, %c0_i32_0 : i32, i32
  }
  func.func @transform_3(%arg0: i32) -> (i32, i32) {
    %c0_i32 = arith.constant 0 : i32
    %c0_i32_0 = arith.constant 0 : i32
    %c0_i32_1 = arith.constant 0 : i32
    return %c0_i32, %c0_i32_0 : i32, i32
  }
  func.func @transform_4(%arg0: i32) -> (i32, i32) {
    %c0_i32 = arith.constant 0 : i32
    %c0_i32_0 = arith.constant 0 : i32
    %c0_i32_1 = arith.constant 0 : i32
    return %c0_i32, %c0_i32_0 : i32, i32
  }
  func.func @transform_5(%arg0: i32) -> (i32, i32) {
    %c0_i32 = arith.constant 0 : i32
    %c0_i32_0 = arith.constant 0 : i32
    %c0_i32_1 = arith.constant 0 : i32
    return %c0_i32, %c0_i32_0 : i32, i32
  }
  func.func @transform_6(%arg0: i32) -> (i32, i32) {
    %c0_i32 = arith.constant 0 : i32
    %c0_i32_0 = arith.constant 0 : i32
    %c0_i32_1 = arith.constant 0 : i32
    return %c0_i32, %c0_i32_0 : i32, i32
  }
  func.func @transform_7(%arg0: i32) -> (i32, i32) {
    %c0_i32 = arith.constant 0 : i32
    %c0_i32_0 = arith.constant 0 : i32
    %c0_i32_1 = arith.constant 0 : i32
    return %c0_i32, %c0_i32_0 : i32, i32
  }
  func.func @transform_8(%arg0: i32) -> (i32, i32) {
    %c0_i32 = arith.constant 0 : i32
    %c0_i32_0 = arith.constant 0 : i32
    %c0_i32_1 = arith.constant 0 : i32
    return %c0_i32, %c0_i32_0 : i32, i32
  }
  func.func @transform_9(%arg0: i32) -> (i32, i32) {
    %c0_i32 = arith.constant 0 : i32
    %c0_i32_0 = arith.constant 0 : i32
    %c0_i32_1 = arith.constant 0 : i32
    return %c0_i32, %c0_i32_0 : i32, i32
  }
  func.func @transform_10(%arg0: i32) -> (i32, i32) {
    %c0_i32 = arith.constant 0 : i32
    %c0_i32_0 = arith.constant 0 : i32
    %c0_i32_1 = arith.constant 0 : i32
    return %c0_i32, %c0_i32_0 : i32, i32
  }
  func.func @transform_11(%arg0: i32) -> (i32, i32) {
    %c0_i32 = arith.constant 0 : i32
    %c0_i32_0 = arith.constant 0 : i32
    %c0_i32_1 = arith.constant 0 : i32
    return %c0_i32, %c0_i32_0 : i32, i32
  }
  func.func @transform_12(%arg0: i32) -> (i32, i32) {
    %c0_i32 = arith.constant 0 : i32
    %c0_i32_0 = arith.constant 0 : i32
    %c0_i32_1 = arith.constant 0 : i32
    return %c0_i32, %c0_i32_0 : i32, i32
  }
  func.func @transform_13(%arg0: i32) -> (i32, i32) {
    %c0_i32 = arith.constant 0 : i32
    %c0_i32_0 = arith.constant 0 : i32
    %c0_i32_1 = arith.constant 0 : i32
    return %c0_i32, %c0_i32_0 : i32, i32
  }
  func.func @transform_14(%arg0: i32) -> (i32, i32) {
    %c0_i32 = arith.constant 0 : i32
    %c0_i32_0 = arith.constant 0 : i32
    %c0_i32_1 = arith.constant 0 : i32
    return %c0_i32, %c0_i32_0 : i32, i32
  }
  func.func @transform_15(%arg0: i32) -> (i32, i32) {
    %c0_i32 = arith.constant 0 : i32
    %c0_i32_0 = arith.constant 0 : i32
    %c0_i32_1 = arith.constant 0 : i32
    return %c0_i32, %c0_i32_0 : i32, i32
  }
  func.func @transform_16(%arg0: i32) -> (i32, i32) {
    %c0_i32 = arith.constant 0 : i32
    %c0_i32_0 = arith.constant 0 : i32
    %c0_i32_1 = arith.constant 0 : i32
    return %c0_i32, %c0_i32_0 : i32, i32
  }
  func.func @transform_17(%arg0: i32) -> (i32, i32) {
    %c0_i32 = arith.constant 0 : i32
    %c0_i32_0 = arith.constant 0 : i32
    %c0_i32_1 = arith.constant 0 : i32
    return %c0_i32, %c0_i32_0 : i32, i32
  }
  func.func @transform_18(%arg0: i32) -> (i32, i32) {
    %c0_i32 = arith.constant 0 : i32
    %c0_i32_0 = arith.constant 0 : i32
    %c0_i32_1 = arith.constant 0 : i32
    return %c0_i32, %c0_i32_0 : i32, i32
  }
  func.func @transform_19(%arg0: i32) -> (i32, i32) {
    %c0_i32 = arith.constant 0 : i32
    %c0_i32_0 = arith.constant 0 : i32
    %c0_i32_1 = arith.constant 0 : i32
    return %c0_i32, %c0_i32_0 : i32, i32
  }
  func.func @transform_20(%arg0: i32) -> (i32, i32, i32) {
    %c0_i32 = arith.constant 0 : i32
    %c0_i32_0 = arith.constant 0 : i32
    %c0_i32_1 = arith.constant 0 : i32
    return %arg0, %c0_i32, %c0_i32_0 : i32, i32, i32
  }
}

</mosaic_0001>

<bundles_post_ra>
// kernel: tile.38
= control target key start
LH: loop header
LB: loop body
LE: loop exit
PB: predicated region body
PF: predicated region fallthrough
CT: control target
= control target key end

     0   :  { %s28_s0 = inlined_call_operand.vmem [shape: f32[4], index: 0, kind: input, shape index: {}]   ;;  %s29_s1 = inlined_call_operand.vmem [shape: f32[16,4], index: 1, kind: output, shape index: {}]  }
   0x1   :  { %v4_v0 = vld [vmem:[%s28_s0] ss:$0 sm:$0xff] }
   0x2   :  { %5 = vst [vmem:[%s29_s1] sm:$0xff] %v4_v0  ;;  %8 = vst [vmem:[%s29_s1 + $0x8] sm:$0xff] %v4_v0 }

// kernel: tile.23
= control target key start
LH: loop header
LB: loop body
LE: loop exit
PB: predicated region body
PF: predicated region fallthrough
CT: control target
= control target key end

     0   :  { %s22_s0 = inlined_call_operand.vmem [shape: f32[8], index: 0, kind: input, shape index: {}]   ;;  %s23_s1 = inlined_call_operand.vmem [shape: f32[4,8], index: 1, kind: output, shape index: {}]  }
   0x1   :  { %v4_v0 = vld [vmem:[%s22_s0] ss:$0 sm:$0xff] }
   0x2   :  { %5 = vst [vmem:[%s23_s1] sm:$0xf] %v4_v0 }

// kernel: tile.39
= control target key start
LH: loop header
LB: loop body
LE: loop exit
PB: predicated region body
PF: predicated region fallthrough
CT: control target
= control target key end

     0   :  { %s131_s10 = smov 60   ;;  %s132_s11 = smov 52   ;;  %vm3_vm0 = vcmask 31744   ;;  %vm9_vm1 = vcmask 523744   ;;  %vm15_vm2 = vcmask 490944   ;;  %vm21_vm3 = vcmask 458144   ;;  %s207_s0 = inlined_call_operand.vmem [shape: f32[16,4], index: 0, kind: input, shape index: {}]   ;;  %s208_s1 = inlined_call_operand.vmem [shape: f32[1,64], index: 1, kind: output, shape index: {}]  }
   0x1   :  { %v101_v0 = vld [vmem:[%s207_s0 + $0xf] sm:$0x1]   ;;  %v103_v1 = vld [vmem:[%s207_s0 + $0xd] sm:$0x1]   ;;  %v102_v2 = vld [vmem:[%s207_s0 + $0xe] sm:$0x1]  }
   0x2   :  { %7 = vrot.lane.b32.xlu0 %v101_v0, %s131_s10  ;;  %19 = vrot.lane.b32.xlu1 %v103_v1, %s132_s11  ;;  %v104_v3 = vld [vmem:[%s207_s0 + $0xc] sm:$0x1]   ;;  %s133_s16 = smov 56   ;;  %s134_s17 = smov 48   ;;  %v105_v4 = vld [vmem:[%s207_s0 + $0xb] sm:$0x1]  }
   0x3   :  { %v106_v5 = vld [vmem:[%s207_s0 + $0xa] sm:$0x1]   ;;  %v2_v6 = vld [vmem:[%s207_s0] sm:$0x1]   ;;  %s135_s24 = smov 44   ;;  %s136_s25 = smov 40  }
   0x4   :  { %4 = vst.msk [vmem:[#allocation0] sm:$0x1] %vm3_vm0, %v2_v6   ;;  %v107_v7 = vld [vmem:[%s207_s0 + $0x9] sm:$0x1]   ;;  %v108_v8 = vld [vmem:[%s207_s0 + $0x8] sm:$0x1]  }
   0x5   :  { %s137_s30 = smov 36   ;;  %s138_s2 = smov 32   ;;  %v109_v9 = vld [vmem:[%s207_s0 + $0x7] sm:$0x1]   ;;  %v110_v10 = vld [vmem:[%s207_s0 + $0x6] sm:$0x1]  }
   0x6   :  { %13 = vrot.lane.b32.xlu0 %v102_v2, %s133_s16  ;;  %25 = vrot.lane.b32.xlu1 %v104_v3, %s134_s17  ;;  %s139_s7 = smov 28   ;;  %s140_s8 = smov 24   ;;  %v111_v11 = vld [vmem:[%s207_s0 + $0x5] sm:$0x1]   ;;  %v112_v12 = vld [vmem:[%s207_s0 + $0x4] sm:$0x1]  }
   0x7   :  { %s141_s13 = smov 20   ;;  %s142_s14 = smov 16   ;;  %v113_v13 = vld [vmem:[%s207_s0 + $0x3] sm:$0x1]   ;;  %v114_v14 = vld [vmem:[%s207_s0 + $0x2] sm:$0x1]  }
   0x8   :  { %s143_s19 = smov 12   ;;  %s144_s20 = smov 8   ;;  %v115_v15 = vld [vmem:[%s207_s0 + $0x1] sm:$0x1]   ;;  %vm27_vm4 = vcmask 425344   ;;  %vm33_vm5 = vcmask 392544  }
   0x9   :  { %s145_s0 = smov 4   ;;  %vm39_vm6 = vcmask 359744   ;;  %vm45_vm7 = vcmask 326944   ;;  %vm51_vm8 = vcmask 294144   ;;  %vm57_vm9 = vcmask 261344  }
   0xa   :  { %31 = vrot.lane.b32.xlu0 %v105_v4, %s135_s24  ;;  %37 = vrot.lane.b32.xlu1 %v106_v5, %s136_s25  ;;  %vm63_vm10 = vcmask 228544   ;;  %vm69_vm11 = vcmask 195744   ;;  %vm75_vm12 = vcmask 162944   ;;  %vm81_vm13 = vcmask 130144  }
   0xb   :  { %vm87_vm14 = vcmask 97344   ;;  %vm93_vm15 = vcmask 64544  }
   0xe   :  { %43 = vrot.lane.b32.xlu0 %v107_v7, %s137_s30  ;;  %49 = vrot.lane.b32.xlu1 %v108_v8, %s138_s2 }
  0x12   :  { %55 = vrot.lane.b32.xlu0 %v109_v9, %s139_s7  ;;  %61 = vrot.lane.b32.xlu1 %v110_v10, %s140_s8 }
  0x16   :  { %67 = vrot.lane.b32.xlu0 %v111_v11, %s141_s13  ;;  %73 = vrot.lane.b32.xlu1 %v112_v12, %s142_s14 }
  0x1a   :  { %79 = vrot.lane.b32.xlu0 %v113_v13, %s143_s19  ;;  %85 = vrot.lane.b32.xlu1 %v114_v14, %s144_s20 }
  0x1e   :  { %91 = vrot.lane.b32.xlu0 %v115_v15, %s145_s0 }
  0x74   :  { %v8_v16 = vpop.permute.xlu0 %7   ;;  %v20_v17 = vpop.permute.xlu1 %19  }
  0x75   :  { %10 = vst.msk [vmem:[#allocation0] sm:$0x1] %vm9_vm1, %v8_v16  }
  0x78   :  { %v14_v18 = vpop.permute.xlu0 %13   ;;  %v26_v19 = vpop.permute.xlu1 %25  }
  0x79   :  { %16 = vst.msk [vmem:[#allocation0] sm:$0x1] %vm15_vm2, %v14_v18  }
  0x7a   :  { %22 = vst.msk [vmem:[#allocation0] sm:$0x1] %vm21_vm3, %v20_v17  }
  0x7b   :  { %28 = vst.msk [vmem:[#allocation0] sm:$0x1] %vm27_vm4, %v26_v19  }
  0x7c   :  { %v32_v20 = vpop.permute.xlu0 %31   ;;  %v38_v21 = vpop.permute.xlu1 %37  }
  0x7d   :  { %34 = vst.msk [vmem:[#allocation0] sm:$0x1] %vm33_vm5, %v32_v20  }
  0x7e   :  { %40 = vst.msk [vmem:[#allocation0] sm:$0x1] %vm39_vm6, %v38_v21  }
  0x80   :  { %v44_v22 = vpop.permute.xlu0 %43   ;;  %v50_v23 = vpop.permute.xlu1 %49  }
  0x81   :  { %46 = vst.msk [vmem:[#allocation0] sm:$0x1] %vm45_vm7, %v44_v22  }
  0x82   :  { %52 = vst.msk [vmem:[#allocation0] sm:$0x1] %vm51_vm8, %v50_v23  }
  0x84   :  { %v56_v24 = vpop.permute.xlu0 %55   ;;  %v62_v25 = vpop.permute.xlu1 %61  }
  0x85   :  { %58 = vst.msk [vmem:[#allocation0] sm:$0x1] %vm57_vm9, %v56_v24  }
  0x86   :  { %64 = vst.msk [vmem:[#allocation0] sm:$0x1] %vm63_vm10, %v62_v25  }
  0x88   :  { %v68_v26 = vpop.permute.xlu0 %67   ;;  %v74_v27 = vpop.permute.xlu1 %73  }
  0x89   :  { %70 = vst.msk [vmem:[#allocation0] sm:$0x1] %vm69_vm11, %v68_v26  }
  0x8a   :  { %76 = vst.msk [vmem:[#allocation0] sm:$0x1] %vm75_vm12, %v74_v27  }
  0x8c   :  { %v80_v28 = vpop.permute.xlu0 %79   ;;  %v86_v29 = vpop.permute.xlu1 %85  }
  0x8d   :  { %82 = vst.msk [vmem:[#allocation0] sm:$0x1] %vm81_vm13, %v80_v28  }
  0x8e   :  { %88 = vst.msk [vmem:[#allocation0] sm:$0x1] %vm87_vm14, %v86_v29  }
  0x90   :  { %v92_v30 = vpop.permute.xlu0 %91  }
  0x91   :  { %94 = vst.msk [vmem:[#allocation0] sm:$0x1] %vm93_vm15, %v92_v30  }
  0x98   :  { %v98_v31 = vld [vmem:[#allocation0] sm:$0x1] }
  0x99   :  { %100 = vst [vmem:[%s208_s1] sm:$0x1] %v98_v31 }

// kernel: tile.24
= control target key start
LH: loop header
LB: loop body
LE: loop exit
PB: predicated region body
PF: predicated region fallthrough
CT: control target
= control target key end

     0   :  { %vm7_vm0 = vcmask 64512   ;;  %s37_s8 = smov 8   ;;  %s38_s9 = smov 16   ;;  %vm13_vm1 = vcmask 261312   ;;  %vm19_vm2 = vcmask 195712   ;;  %vm25_vm3 = vcmask 130112   ;;  %s55_s0 = inlined_call_operand.vmem [shape: f32[4,8], index: 0, kind: input, shape index: {}]   ;;  %s56_s1 = inlined_call_operand.vmem [shape: f32[1,32], index: 1, kind: output, shape index: {}]  }
   0x1   :  { %v4_v0 = vld [vmem:[%s55_s0] sm:$0xf]  ;;  %s36_s0 = smov 24  }
   0x2   :  { %5 = vst [vmem:[#allocation1] sm:$0xf] %v4_v0 }
   0x9   :  { %v10_v1 = vld [vmem:[#allocation1 + $0x3] sm:$0x1]   ;;  %v22_v2 = vld [vmem:[#allocation1 + $0x1] sm:$0x1]   ;;  %v6_v3 = vld [vmem:[#allocation1] sm:$0x1]  }
   0xa   :  { %11 = vrot.lane.b32.xlu0 %v10_v1, %s36_s0  ;;  %23 = vrot.lane.b32.xlu1 %v22_v2, %s37_s8  ;;  %v16_v4 = vld [vmem:[#allocation1 + $0x2] sm:$0x1]   ;;  %8 = vst.msk [vmem:[#allocation0] sm:$0x1] %vm7_vm0, %v6_v3  }
   0xe   :  { %17 = vrot.lane.b32.xlu0 %v16_v4, %s38_s9 }
  0x7c   :  { %v12_v5 = vpop.permute.xlu0 %11   ;;  %v24_v6 = vpop.permute.xlu1 %23  }
  0x7d   :  { %14 = vst.msk [vmem:[#allocation0] sm:$0x1] %vm13_vm1, %v12_v5  }
  0x80   :  { %v18_v7 = vpop.permute.xlu0 %17  }
  0x81   :  { %20 = vst.msk [vmem:[#allocation0] sm:$0x1] %vm19_vm2, %v18_v7  }
  0x82   :  { %26 = vst.msk [vmem:[#allocation0] sm:$0x1] %vm25_vm3, %v24_v6  }
  0x89   :  { %v30_v8 = vld [vmem:[#allocation0] sm:$0x1] }
  0x8a   :  { %32 = vst [vmem:[%s56_s1] sm:$0x1] %v30_v8 }

// kernel: mask_decoder_forward.1
= control target key start
LH: loop header
LB: loop body
LE: loop exit
PB: predicated region body
PF: predicated region fallthrough
CT: control target
= control target key end

     0   :  { %s3960_s0 = inlined_call_operand.vmem [shape: f32[2,64,32], index: 0, kind: input, shape index: {}]   ;;  %s3961_s1 = inlined_call_operand.vmem [shape: f32[1,64,32], index: 1, kind: input, shape index: {}]   ;;  %s3962_s2 = inlined_call_operand.vmem [shape: f32[8,32], index: 2, kind: input, shape index: {}]   ;;  %s3963_s3 = inlined_call_operand.vmem [shape: f32[8,32], index: 3, kind: input, shape index: {}]   ;;  %s3964_s4 = inlined_call_operand.vmem [shape: f32[32,32], index: 4, kind: input, shape index: {}]   ;;  %s3965_s5 = inlined_call_operand.vmem [shape: f32[32,32], index: 5, kind: input, shape index: {}]   ;;  %s3966_s6 = inlined_call_operand.vmem [shape: f32[32,32], index: 6, kind: input, shape index: {}]   ;;  %s3967_s7 = inlined_call_operand.vmem [shape: f32[1,32], index: 7, kind: input, shape index: {}]   ;;  %s3968_s8 = inlined_call_operand.vmem [shape: f32[32,32], index: 8, kind: input, shape index: {}]   ;;  %s3969_s9 = inlined_call_operand.vmem [shape: f32[1,32], index: 9, kind: input, shape index: {}]   ;;  %s3970_s10 = inlined_call_operand.vmem [shape: f32[32,64], index: 10, kind: input, shape index: {}]   ;;  %s3971_s11 = inlined_call_operand.vmem [shape: f32[1,64], index: 11, kind: input, shape index: {}]   ;;  %s3972_s12 = inlined_call_operand.vmem [shape: f32[32,32], index: 12, kind: input, shape index: {}]   ;;  %s3973_s13 = inlined_call_operand.vmem [shape: f32[1,32], index: 13, kind: input, shape index: {}]   ;;  %s3974_s14 = inlined_call_operand.vmem [shape: f32[1,32], index: 14, kind: input, shape index: {}]   ;;  %s3975_s15 = inlined_call_operand.vmem [shape: f32[1,32], index: 15, kind: input, shape index: {}]   ;;  %s3976_s16 = inlined_call_operand.vmem [shape: f32[32,64], index: 16, kind: input, shape index: {}]   ;;  %s3977_s17 = inlined_call_operand.vmem [shape: f32[1,64], index: 17, kind: input, shape index: {}]   ;;  %s3978_s18 = inlined_call_operand.vmem [shape: f32[32,32], index: 18, kind: input, shape index: {}]   ;;  %s3979_s19 = inlined_call_operand.vmem [shape: f32[16,64], index: 19, kind: input, shape index: {}]   ;;  %s3980_s20 = inlined_call_operand.vmem [shape: f32[2,16,64], index: 20, kind: output, shape index: {}]  }
   0x1   :  { %3983 = sst [smem:[#allocation2_spill]] %s3960_s0 }
   0x2   :  { %3984 = sst [smem:[#allocation3_spill]] %s3961_s1  ;;  %s3297_s1 = smov 0  }
   0x3   :  { %3985 = sst [smem:[#allocation4_spill]] %s3962_s2 }
   0x4   :  { %3986 = sst [smem:[#allocation5_spill]] %s3963_s3 }
   0x5   :  { %3987 = sst [smem:[#allocation6_spill]] %s3964_s4 }
   0x6 LB: > { %s2552_s22 = sadd.s32 4294967295, %s3187_s1   ;;  %p2556_p0 = scmp.ge.s32.totalorder %s3187_s1, 1  ;;  %s3187_s1 = sphi %s3297_s1, %s30_s1  }
   0x7   : > { %p562_p1 = scmp.lt.s32.totalorder %s3187_s1, 3 }
   0x9   : > { %p563_p2 = pnand %p2556_p0, %p562_p1 }
   0xa   : > { %s3988_s2 = sld [smem:[#allocation6_spill]] (!%p563_p2)  ;;  %p620_p3 = scmp.lt.s32.totalorder (!%p563_p2), %s2552_s22, 1  ;;  %vm658_vm0 = vcmask (!%p563_p2), 261120   ;;  %v3189_v30 = vmov (!%p563_p2), 0.0|0.0   ;;  %vm3190_vm1 = vmmov (!%p563_p2), 0   ;;  %v3191_v31 = vmov (!%p563_p2), 0.0  }
   0xb   : > { %566 = sbr.rel (%p563_p2) target bundleno = 2472 (0x9a8), region = 100  ;;  %s3989_s21 = sld [smem:[#allocation3_spill]] (!%p563_p2)  ;;  %vm3386_vm2 = vmpackc.low (!%p563_p2), %vm658_vm0, %vm658_vm0  ;;  %v788_v46 = vld [vmem:[%s3965_s5] sm:$0xff] (!%p563_p2)  ;;  %v789_v47 = vld [vmem:[%s3965_s5 + $0x8] sm:$0xff] (!%p563_p2)  ;;  %vm1020_vm3 = vcmask (!%p563_p2), 523264  }
   0xc   : > { %s3990_s26 = sld [smem:[#allocation2_spill]] (!%p563_p2)  ;;  %s3993_s30 = sld [smem:[#allocation4_spill]] (!%p563_p2)  ;;  %v790_v48 = vld [vmem:[%s3965_s5 + $0x10] sm:$0xff] (!%p563_p2)  ;;  %v2976_v49 = vpack.c.bf16 (!%p563_p2), %v789_v47, %v788_v46  ;;  %v791_v50 = vld [vmem:[%s3965_s5 + $0x18] sm:$0xff] (!%p563_p2) }
   0xd   : > { %v2980_v51 = vpack.c.bf16 (!%p563_p2), %v791_v50, %v790_v48  ;;  %s3994_s0 = sld [smem:[#allocation5_spill]] (!%p563_p2)  ;;  %v1371_v46 = vld [vmem:[%s3972_s12 + $0x18] sm:$0xff] (!%p563_p2) }
   0xe   : > { %2977 = vmatprep.subr.bf16.mxu1 (!%p563_p2), %v2976_v49 }
   0xf   : > { %2979 = vmatpush3.bf16.msra.mxu1 (!%p563_p2), %v2976_v49 }
  0x10   : > { %v654_v0 = vld [vmem:[%s3988_s2] sm:$0xff] (!%p563_p2)  ;;  %v655_v1 = vld [vmem:[%s3988_s2 + $0x8] sm:$0xff] (!%p563_p2)  ;;  %v656_v2 = vld [vmem:[%s3988_s2 + $0x10] sm:$0xff] (!%p563_p2)  ;;  %2981 = vmatprep.subr.bf16.mxu1 (!%p563_p2), %v2980_v51 }
  0x11   : > { %v2968_v3 = vpack.c.bf16 (!%p563_p2), %v655_v1, %v654_v0  ;;  %v657_v4 = vld [vmem:[%s3988_s2 + $0x18] sm:$0xff] (!%p563_p2)  ;;  %v638_v6 = vld [vmem:[%s3989_s21] sm:$0xff] (!%p563_p2)  ;;  %v639_v7 = vld [vmem:[%s3989_s21 + $0x8] sm:$0xff] (!%p563_p2) }
  0x12   : > { %v2972_v5 = vpack.c.bf16 %v657_v4, %v656_v2  ;;  %s3998_s22 = smov (!%p620_p3, %s2552_s22), 1  ;;  %v640_v8 = vld [vmem:[%s3989_s21 + $0x10] sm:$0xff]  ;;  %v641_v16 = vld [vmem:[%s3989_s21 + $0x18] sm:$0xff]  ;;  %v642_v18 = vld [vmem:[%s3989_s21 + $0x20] sm:$0xff] }
  0x13   : > { %2969 = vmatprep.subr.bf16.mxu0 %v2968_v3  ;;  %s2641_s29 = sshll.u32 %s3998_s22, 6  ;;  %v643_v22 = vld [vmem:[%s3989_s21 + $0x28] sm:$0xff]  ;;  %v644_v24 = vld [vmem:[%s3989_s21 + $0x30] sm:$0xff]  ;;  %v645_v28 = vld [vmem:[%s3989_s21 + $0x38] sm:$0xff]  ;;  %2983 = vmatpush3.bf16.msra.mxu1 %v2980_v51 }
  0x14   : > { %2971 = vmatpush3.bf16.msra.mxu0 %v2968_v3  ;;  %s624_s27 = scalar_lea.vmem %s3990_s26, %s2641_s29  ;;  %v921_v45 = vld [vmem:[%s3993_s30] sm:$0xff]  ;;  %3000 = vmatprep.subr.bf16.mxu1 %v3189_v30 }
  0x15   : > { %2973 = vmatprep.subr.bf16.mxu0 %v2972_v5  ;;  %v3332_v9 = vld [vmem:[%s624_s27] sm:$0xff]  ;;  %v3334_v10 = vld [vmem:[%s624_s27 + $0x8] sm:$0xff]  ;;  %v3336_v11 = vld [vmem:[%s624_s27 + $0x10] sm:$0xff] }
  0x16   : > { %v646_v12 = vadd.f32 %v638_v6, %v3332_v9  ;;  %v647_v13 = vadd.f32 %v639_v7, %v3334_v10  ;;  %2786 = vmatprep.mubr.msk.f32.mxu1 %vm658_vm0, %v3332_v9  ;;  %v648_v14 = vadd.f32 %v640_v8, %v3336_v11  ;;  %v3343_v15 = vld [vmem:[%s624_s27 + $0x18] sm:$0xff]  ;;  %v3349_v17 = vld [vmem:[%s624_s27 + $0x20] sm:$0xff]  ;;  %v3358_v21 = vld [vmem:[%s624_s27 + $0x28] sm:$0xff] }
  0x17   : > { %v649_v19 = vadd.f32 %v641_v16, %v3343_v15  ;;  %v650_v20 = vadd.f32 %v642_v18, %v3349_v17  ;;  %v3363_v23 = vld [vmem:[%s624_s27 + $0x30] sm:$0xff]  ;;  %v651_v25 = vadd.f32 %v643_v22, %v3358_v21  ;;  %v3372_v27 = vld [vmem:[%s624_s27 + $0x38] sm:$0xff]  ;;  %2787 = vmatmul.mubr.msk.f32.vlgmr.msra.gmra.mrb[0].mxu1 %vm658_vm0, %v3334_v10  ;;  %v2589_v51 = vld [vmem:[%s3969_s9] ss:$0 sm:$0xff] }
  0x18   : > { %2975 = vmatpush3.bf16.msra.mxu0 %v2972_v5  ;;  %2766 = vmatprep.mubr.msk.f32.mxu0 %vm658_vm0, %v646_v12  ;;  %v652_v26 = vadd.f32 %v644_v24, %v3363_v23  ;;  %v653_v29 = vadd.f32 %v645_v28, %v3372_v27  ;;  %v1107_v12 = vld [vmem:[%s3966_s6] sm:$0xff]  ;;  %v1110_v22 = vld [vmem:[%s3966_s6 + $0x18] sm:$0xff] }
  0x19   : > { %2984 = vmatprep.subr.bf16.mxu0 %v3189_v30  ;;  %2789 = vmatprep.mubr.msk.f32.mxu1 %vm658_vm0, %v3336_v11 }
  0x1b   : > { %2767 = vmatmul.mubr.msk.f32.vlgmr.msra.gmra.mrb[0].mxu0 %vm658_vm0, %v647_v13  ;;  %2790 = vmatmul.mubr.msk.f32.gmra.mrb[2].mxu1 %vm658_vm0, %v3343_v15  ;;  %v1108_v13 = vld [vmem:[%s3966_s6 + $0x8] sm:$0xff] }
  0x1c   : > { %2769 = vmatprep.mubr.msk.f32.mxu0 %vm658_vm0, %v648_v14  ;;  %2792 = vmatprep.mubr.msk.f32.mxu1 %vm658_vm0, %v3349_v17  ;;  %v3013_v14 = vpack.c.bf16 %v1108_v13, %v1107_v12 }
  0x1f   : > { %2770 = vmatmul.mubr.msk.f32.gmra.mrb[2].mxu0 %vm658_vm0, %v649_v19  ;;  %2793 = vmatmul.mubr.msk.f32.gmra.mrb[4].mxu1 %vm658_vm0, %v3358_v21 }
  0x20   : > { %2772 = vmatprep.mubr.msk.f32.mxu0 %vm658_vm0, %v650_v20  ;;  %2795 = vmatprep.mubr.msk.f32.mxu1 %vm658_vm0, %v3363_v23  ;;  %v1109_v20 = vld [vmem:[%s3966_s6 + $0x10] sm:$0xff] }
  0x21   : > { %v3016_v24 = vpack.c.bf16 %v1110_v22, %v1109_v20 }
  0x23   : > { %2773 = vmatmul.mubr.msk.f32.gmra.mrb[4].mxu0 %vm658_vm0, %v651_v25  ;;  %2796 = vmatmul.mubr.msk.f32.gmra.mrb[6].mxu1 %vm658_vm0, %v3372_v27  ;;  %v1192_v25 = vld [vmem:[%s3968_s8] sm:$0xff] }
  0x24   : > { %2775 = vmatprep.mubr.msk.f32.mxu0 %vm658_vm0, %v652_v26  ;;  %2833 = vmatprep.mubr.msk.f32.mxu1 %vm3190_vm1, %v3191_v31  ;;  %v1193_v26 = vld [vmem:[%s3968_s8 + $0x8] sm:$0xff] }
  0x25   : > { %v3019_v28 = vpack.c.bf16 %v1193_v26, %v1192_v25 }
  0x27   : > { %2776 = vmatmul.mubr.msk.f32.gmra.mrb[6].mxu0 %vm658_vm0, %v653_v29  ;;  %v1032_v29 = vld [vmem:[%s3994_s0] sm:$0xff]  ;;  %s2642_s0 = sshll.u32 %s3998_s22, 4 }
  0x28   : > { %2814 = vmatprep.mubr.msk.f32.mxu0 %vm3190_vm1, %v3191_v31  ;;  %s629_s25 = scalar_lea.vmem %s3980_s20, %s2642_s0 }
  0xea   : > { %v2788_v56 = vpop.f32.mrb[0].mxu1 }
  0xeb   : > { %v882_v57 = vpop.f32.mrb[1].mxu1 }
  0xec   : > { %v3001_v58 = vpack.c.bf16 %v2788_v56, %v882_v57  ;;  %v2593_v56 = vld [vmem:[%s3973_s13] ss:$0 sm:$0xff] }
  0xee   : > { %v2768_v32 = vpop.f32.mrb[0].mxu0  ;;  %v2791_v59 = vpop.f32.mrb[2].mxu1  ;;  %3002 = vmatpush3.bf16.msra.mxu1 %v3001_v58 }
  0xef   : > { %v749_v33 = vpop.f32.mrb[1].mxu0  ;;  %v892_v60 = vpop.f32.mrb[3].mxu1  ;;  %3003 = vmatprep.subr.bf16.mxu1 %v3189_v30 }
  0xf0   : > { %v2985_v35 = vpack.c.bf16 %v2768_v32, %v749_v33  ;;  %v3004_v61 = vpack.c.bf16 %v2791_v59, %v892_v60 }
  0xf2   : > { %2987 = vmatpush3.bf16.xpose.msk.msra.mxu0 %vm3386_vm2, %v2985_v35  ;;  %v2771_v36 = vpop.f32.mrb[2].mxu0  ;;  %3005 = vmatpush3.bf16.msra.mxu1 %v3004_v61  ;;  %v2794_v3 = vpop.f32.mrb[4].mxu1  ;;  %v1194_v35 = vld [vmem:[%s3968_s8 + $0x10] sm:$0xff] }
  0xf3   : > { %v759_v37 = vpop.f32.mrb[3].mxu0  ;;  %2988 = vmatprep.subr.bf16.mxu0 %v3189_v30  ;;  %3006 = vmatprep.subr.bf16.mxu1 %v3189_v30  ;;  %v902_v4 = vpop.f32.mrb[5].mxu1 }
  0xf4   : > { %v2989_v38 = vpack.c.bf16 %v2771_v36, %v759_v37  ;;  %v3007_v5 = vpack.c.bf16 %v2794_v3, %v902_v4  ;;  %v1195_v36 = vld [vmem:[%s3968_s8 + $0x18] sm:$0xff] }
  0xf5   : > { %v3022_v37 = vpack.c.bf16 %v1195_v36, %v1194_v35 }
  0xf6   : > { %v2774_v39 = vpop.f32.mrb[4].mxu0  ;;  %v2797_v6 = vpop.f32.mrb[6].mxu1  ;;  %3008 = vmatpush3.bf16.msra.mxu1 %v3007_v5 }
  0xf7   : > { %v769_v40 = vpop.f32.mrb[5].mxu0  ;;  %v912_v7 = vpop.f32.mrb[7].mxu1  ;;  %3009 = vmatprep.subr.bf16.mxu1 %v3189_v30 }
  0xf8   : > { %v2993_v41 = vpack.c.bf16 %v2774_v39, %v769_v40  ;;  %v3010_v8 = vpack.c.bf16 %v2797_v6, %v912_v7  ;;  %v1369_v39 = vld [vmem:[%s3972_s12 + $0x8] sm:$0xff] }
  0xfa   : > { %2991 = vmatpush3.bf16.xpose.msk.msra.mxu0 %vm3386_vm2, %v2989_v38  ;;  %v2777_v42 = vpop.f32.mrb[6].mxu0  ;;  %3011 = vmatpush3.bf16.msra.mxu1 %v3010_v8  ;;  %v1368_v38 = vld [vmem:[%s3972_s12] sm:$0xff] }
  0xfb   : > { %2992 = vmatprep.subr.bf16.mxu0 %v3189_v30  ;;  %v779_v43 = vpop.f32.mrb[7].mxu0  ;;  %3018 = vmatprep.subr.bf16.mxu1 %v3189_v30  ;;  %v3030_v40 = vpack.c.bf16 %v1369_v39, %v1368_v38 }
  0xfc   : > { %v2997_v44 = vpack.c.bf16 %v2777_v42, %v779_v43  ;;  %v2587_v43 = vld [vmem:[%s3967_s7] ss:$0 sm:$0xff] }
 0x102   : > { %2995 = vmatpush3.bf16.xpose.msk.msra.mxu0 %vm3386_vm2, %v2993_v41  ;;  %v1278_v41 = vld [vmem:[%s3970_s10 + $0x8] sm:$0xff] }
 0x103   : > { %2996 = vmatprep.subr.bf16.mxu0 %v3189_v30 }
 0x10a   : > { %2999 = vmatpush3.bf16.xpose.msk.msra.mxu0 %vm3386_vm2, %v2997_v44 }
 0x10b   : > { %3012 = vmatprep.subr.bf16.mxu0 %v3189_v30 }
 0x111   : > { %2815 = vmatmul.mubr.msk.f32.vlgmr.msra.gmra.mrb[8].mxu0 %vm658_vm0, %v921_v45  ;;  %v1370_v45 = vld [vmem:[%s3972_s12 + $0x10] sm:$0xff] }
 0x112   : > { %2844 = vmatprep.mubr.msk.f32.mxu0 %vm3190_vm1, %v3191_v31  ;;  %3014 = vmatpush3.bf16.msra.mxu0 %v3013_v14  ;;  %v3034_v50 = vpack.c.bf16 %v1371_v46, %v1370_v45  ;;  %v2025_v45 = vld [vmem:[%s3976_s16 + $0x8] sm:$0xff]  ;;  %v2026_v46 = vld [vmem:[%s3976_s16 + $0x10] sm:$0xff] }
 0x113   : > { %3015 = vmatprep.subr.bf16.mxu0 %v3189_v30 }
 0x116   : > { %3017 = vmatpush3.bf16.msra.mxu0 %v3016_v24 }
 0x117   : > { %3024 = vmatprep.subr.bf16.mxu0 %v3189_v30 }
 0x1e4   : > { %v1015_v52 = vpop.f32.mrb[8].mxu0 }
 0x1e5   : > { %v1019_v53 = vmul.f32 0.17677669, %v1015_v52  ;;  %v2816_v54 = vpop.f32.mrb[9].mxu0 }
 0x1e7   : > { %v1021_v55 = vsel %vm1020_vm3, %v1019_v53, -inf }
 0x1e8   : > { %1022 = vmax.xlane.f32.xlu0 %v1021_v55 }
 0x275   : > { %v1023_v62 = vpop.xlane.xlu0 %1022 }
 0x276   : > { %v1024_v63 = vsub.f32 %v1019_v53, %v1023_v62 }
 0x278   : > { %v1025_v0 = vmul.f32 1.442695, %v1024_v63 }
 0x27a   : > { %3097 = vpow2.f32 %v1025_v0 }
 0x284   : > { %v3098_v1 = vpop.eup %3097 }
 0x285   : > { %v1027_v2 = vsel %vm1020_vm3, %v3098_v1, 0.0 }
 0x286   : > { %1028 = vadd.xlane.f32.xlu0 %v1027_v2 }
 0x313   : > { %v1029_v16 = vpop.xlane.xlu0 %1028 }
 0x314   : > { %3099 = vrcp.f32 %v1029_v16 }
 0x31e   : > { %v3100_v18 = vpop.eup %3099 }
 0x31f   : > { %v1031_v19 = vmul.f32 %v3100_v18, %v3098_v1 }
 0x321   : > { %2834 = vmatmul.mubr.msk.f32.vlgmr.msra.gmra.mrb[8].mxu1 %vm1020_vm3, %v1031_v19 }
 0x322   : > { %2855 = vmatprep.mubr.msk.f32.mxu1 %vm3190_vm1, %v3191_v31  ;;  %3020 = vmatpush3.bf16.msra.mxu1 %v3019_v28 }
 0x323   : > { %3021 = vmatprep.subr.bf16.mxu1 %v3189_v30 }
 0x326   : > { %3023 = vmatpush3.bf16.msra.mxu1 %v3022_v37 }
 0x327   : > { %3031 = vmatprep.subr.bf16.mxu1 %v3030_v40 }
 0x3f4   : > { %v1102_v32 = vpop.f32.mrb[8].mxu1 }
 0x3f5   : > { %v1106_v33 = vadd.f32 %v1102_v32, %v1032_v29  ;;  %v2835_v34 = vpop.f32.mrb[9].mxu1 }
 0x3f7   : > { %2845 = vmatmul.mubr.msk.f32.vlgmr.msra.gmra.mrb[10].mxu0 %vm658_vm0, %v1106_v33 }
 0x3f8   : > { %2866 = vmatprep.mubr.msk.f32.mxu0 %vm3190_vm1, %v3191_v31  ;;  %v1277_v31 = vld [vmem:[%s3970_s10] sm:$0xff] }
 0x3f9   : > { %v3025_v42 = vpack.c.bf16 %v1278_v41, %v1277_v31 }
 0x3fb   : > { %3026 = vmatpush3.bf16.msra.mxu0 %v3025_v42 }
 0x3fc   : > { %3027 = vmatprep.subr.bf16.mxu0 %v3189_v30 }
 0x4ca   : > { %v1187_v44 = vpop.f32.mrb[10].mxu0 }
 0x4cb   : > { %v1188_v47 = vadd.f32 %v2587_v43, %v1187_v44  ;;  %v2846_v48 = vpop.f32.mrb[11].mxu0  ;;  %v2024_v44 = vld [vmem:[%s3976_s16] sm:$0xff] }
 0x4cc   : > { %v2027_v48 = vld [vmem:[%s3976_s16 + $0x18] sm:$0xff] }
 0x4cd   : > { %v1191_v49 = vmax.f32 %v1188_v47, 0.0  ;;  %v3054_v47 = vpack.c.bf16 %v2025_v45, %v2024_v44 }
 0x4cf   : > { %2856 = vmatmul.mubr.msk.f32.vlgmr.msra.gmra.mrb[10].mxu1 %vm658_vm0, %v1191_v49  ;;  %v3058_v49 = vpack.c.bf16 %v2027_v48, %v2026_v46 }
 0x4d0   : > { %3033 = vmatpush3.bf16.msra.mxu1 %v3030_v40  ;;  %2877 = vmatprep.mubr.msk.f32.mxu1 %vm658_vm0, %v3332_v9  ;;  %v1279_v9 = vld [vmem:[%s3970_s10 + $0x10] sm:$0xff] }
 0x4d1   : > { %3035 = vmatprep.subr.bf16.mxu1 %v3034_v50 }
 0x4d4   : > { %3037 = vmatpush3.bf16.msra.mxu1 %v3034_v50 }
 0x4d7   : > { %2878 = vmatmul.mubr.msk.f32.vlgmr.msra.gmra.mrb[12].mxu1 %vm658_vm0, %v3334_v10  ;;  %v1280_v10 = vld [vmem:[%s3970_s10 + $0x18] sm:$0xff] }
 0x4d8   : > { %2880 = vmatprep.mubr.msk.f32.mxu1 %vm658_vm0, %v3336_v11  ;;  %v3028_v11 = vpack.c.bf16 %v1280_v10, %v1279_v9 }
 0x4da   : > { %3029 = vmatpush3.bf16.msra.mxu0 %v3028_v11 }
 0x4db   : > { %2881 = vmatmul.mubr.msk.f32.gmra.mrb[14].mxu1 %vm658_vm0, %v3343_v15  ;;  %v1484_v15 = vld [vmem:[%s3978_s18] sm:$0xff] }
 0x4dc   : > { %2883 = vmatprep.mubr.msk.f32.mxu1 %vm658_vm0, %v3349_v17  ;;  %v1485_v17 = vld [vmem:[%s3978_s18 + $0x8] sm:$0xff] }
 0x4df   : > { %2884 = vmatmul.mubr.msk.f32.gmra.mrb[16].mxu1 %vm658_vm0, %v3358_v21  ;;  %v3038_v21 = vpack.c.bf16 %v1485_v17, %v1484_v15 }
 0x4e0   : > { %2886 = vmatprep.mubr.msk.f32.mxu1 %vm658_vm0, %v3363_v23  ;;  %v1486_v23 = vld [vmem:[%s3978_s18 + $0x10] sm:$0xff] }
 0x4e1   : > { %3039 = vmatprep.subr.bf16.mxu0 %v3038_v21  ;;  %3047 = vmatprep.subr.bf16.mxu1 %v3038_v21 }
 0x4e2   : > { %3049 = vmatpush3.bf16.msra.mxu1 %v3038_v21 }
 0x4e3   : > { %2887 = vmatmul.mubr.msk.f32.gmra.mrb[18].mxu1 %vm658_vm0, %v3372_v27  ;;  %v1487_v27 = vld [vmem:[%s3978_s18 + $0x18] sm:$0xff] }
 0x4e4   : > { %v3042_v30 = vpack.c.bf16 %v1487_v27, %v1486_v23 }
 0x4e6   : > { %3051 = vmatprep.subr.bf16.mxu1 %v3042_v30 }
 0x4e7   : > { %3053 = vmatpush3.bf16.msra.mxu1 %v3042_v30 }
 0x5a2   : > { %v1272_v52 = vpop.f32.mrb[10].mxu1 }
 0x5a3   : > { %v1273_v53 = vadd.f32 %v2589_v51, %v1272_v52  ;;  %v2857_v54 = vpop.f32.mrb[11].mxu1 }
 0x5a5   : > { %v1276_v55 = vmax.f32 %v1273_v53, 0.0 }
 0x5a7   : > { %2867 = vmatmul.mubr.msk.f32.vlgmr.msra.gmra.mrb[12].mxu0 %vm658_vm0, %v1276_v55  ;;  %v2618_v55 = vld [vmem:[%s3974_s14] ss:$0 sm:$0xff] }
 0x5a8   : > { %3041 = vmatpush3.bf16.msra.mxu0 %v3038_v21 }
 0x5a9   : > { %3043 = vmatprep.subr.bf16.mxu0 %v3042_v30 }
 0x5aa   : > { %v2879_v57 = vpop.f32.mrb[12].mxu1 }
 0x5ab   : > { %v1445_v58 = vpop.f32.mrb[13].mxu1  ;;  %v1451_v60 = vadd.f32 %v2879_v57, %v2593_v56 }
 0x5ac   : > { %v1446_v59 = vadd.f32 %v2593_v56, %v1445_v58  ;;  %3045 = vmatpush3.bf16.msra.mxu0 %v3042_v30 }
 0x5ad   : > { %3055 = vmatprep.subr.bf16.mxu0 %v3054_v47 }
 0x5ae   : > { %v2882_v61 = vpop.f32.mrb[14].mxu1  ;;  %2897 = vmatprep.mubr.msk.f32.mxu0 %vm658_vm0, %v1446_v59 }
 0x5af   : > { %v1461_v62 = vadd.f32 %v2882_v61, %v2593_v56  ;;  %v1455_v63 = vpop.f32.mrb[15].mxu1  ;;  %2898 = vmatmul.mubr.msk.f32.vlgmr.msra.gmra.mrb[14].mxu0 %vm658_vm0, %v1451_v60  ;;  %v2619_v61 = vld [vmem:[%s3975_s15] ss:$0 sm:$0xff] }
 0x5b0   : > { %v1456_v0 = vadd.f32 %v2593_v56, %v1455_v63  ;;  %3057 = vmatpush3.bf16.msra.mxu0 %v3054_v47 }
 0x5b1   : > { %3059 = vmatprep.subr.bf16.mxu0 %v3058_v49 }
 0x5b2   : > { %v2885_v1 = vpop.f32.mrb[16].mxu1  ;;  %2900 = vmatprep.mubr.msk.f32.mxu0 %vm658_vm0, %v1456_v0 }
 0x5b3   : > { %v1471_v2 = vadd.f32 %v2885_v1, %v2593_v56  ;;  %v1465_v3 = vpop.f32.mrb[17].mxu1  ;;  %2901 = vmatmul.mubr.msk.f32.gmra.mrb[16].mxu0 %vm658_vm0, %v1461_v62 }
 0x5b4   : > { %v1466_v4 = vadd.f32 %v2593_v56, %v1465_v3  ;;  %3061 = vmatpush3.bf16.msra.mxu0 %v3058_v49 }
 0x5b6   : > { %v2888_v5 = vpop.f32.mrb[18].mxu1  ;;  %2903 = vmatprep.mubr.msk.f32.mxu0 %vm658_vm0, %v1466_v4 }
 0x5b7   : > { %v1481_v6 = vadd.f32 %v2888_v5, %v2593_v56  ;;  %v1475_v7 = vpop.f32.mrb[19].mxu1  ;;  %2904 = vmatmul.mubr.msk.f32.gmra.mrb[18].mxu0 %vm658_vm0, %v1471_v2 }
 0x5b8   : > { %v1476_v8 = vadd.f32 %v2593_v56, %v1475_v7 }
 0x5ba   : > { %2906 = vmatprep.mubr.msk.f32.mxu0 %vm658_vm0, %v1476_v8 }
 0x5bb   : > { %2907 = vmatmul.mubr.msk.f32.gmra.mrb[20].mxu0 %vm658_vm0, %v1481_v6 }
 0x67a   : > { %v3551_v12 = vpop.f32.mrb[12].mxu0 }
 0x67b   : > { %v2868_v13 = vpop.f32.mrb[13].mxu0 }
 0x682   : > { %v2899_v14 = vpop.f32.mrb[14].mxu0 }
 0x683   : > { %v3553_v16 = vsub.f32 %v1451_v60, %v2899_v14  ;;  %v1578_v18 = vpop.f32.mrb[15].mxu0 }
 0x684   : > { %v3555_v19 = vsub.f32 %v1446_v59, %v1578_v18 }
 0x685   : > { %v1626_v24 = vmul.f32 %v3553_v16, %v3553_v16 }
 0x686   : > { %v1625_v20 = vmul.f32 %v3555_v19, %v3555_v19  ;;  %v2902_v22 = vpop.f32.mrb[16].mxu0 }
 0x687   : > { %v3561_v25 = vsub.f32 %v1461_v62, %v2902_v22  ;;  %v1588_v26 = vpop.f32.mrb[17].mxu0 }
 0x688   : > { %v3563_v28 = vsub.f32 %v1456_v0, %v1588_v26  ;;  %2917 = vmatprep.mubr.msk.f32.mxu1 %vm658_vm0, %v1625_v20 }
 0x689   : > { %2918 = vmatmul.mubr.msk.f32.vlgmr.msra.gmra.mrb[20].mxu1 %vm658_vm0, %v1626_v24  ;;  %v1628_v33 = vmul.f32 %v3561_v25, %v3561_v25 }
 0x68a   : > { %v1627_v29 = vmul.f32 %v3563_v28, %v3563_v28  ;;  %v2905_v32 = vpop.f32.mrb[18].mxu0 }
 0x68b   : > { %v3571_v34 = vsub.f32 %v1471_v2, %v2905_v32  ;;  %v1598_v35 = vpop.f32.mrb[19].mxu0 }
 0x68c   : > { %v3573_v36 = vsub.f32 %v1466_v4, %v1598_v35  ;;  %2920 = vmatprep.mubr.msk.f32.mxu1 %vm658_vm0, %v1627_v29 }
 0x68d   : > { %2921 = vmatmul.mubr.msk.f32.gmra.mrb[22].mxu1 %vm658_vm0, %v1628_v33  ;;  %v1630_v39 = vmul.f32 %v3571_v34, %v3571_v34 }
 0x68e   : > { %v1629_v37 = vmul.f32 %v3573_v36, %v3573_v36  ;;  %v2908_v38 = vpop.f32.mrb[20].mxu0 }
 0x68f   : > { %v3581_v40 = vsub.f32 %v1481_v6, %v2908_v38  ;;  %v1608_v31 = vpop.f32.mrb[21].mxu0 }
 0x690   : > { %v3583_v41 = vsub.f32 %v1476_v8, %v1608_v31  ;;  %2923 = vmatprep.mubr.msk.f32.mxu1 %vm658_vm0, %v1629_v37 }
 0x691   : > { %2924 = vmatmul.mubr.msk.f32.gmra.mrb[24].mxu1 %vm658_vm0, %v1630_v39  ;;  %v1632_v43 = vmul.f32 %v3581_v40, %v3581_v40 }
 0x692   : > { %v1631_v42 = vmul.f32 %v3583_v41, %v3583_v41 }
 0x694   : > { %2926 = vmatprep.mubr.msk.f32.mxu1 %vm658_vm0, %v1631_v42 }
 0x695   : > { %2927 = vmatmul.mubr.msk.f32.gmra.mrb[26].mxu1 %vm658_vm0, %v1632_v43 }
 0x75c   : > { %v2919_v50 = vpop.f32.mrb[20].mxu1 }
 0x75d   : > { %v1729_v9 = vadd.f32 1e-06, %v2919_v50  ;;  %v1723_v10 = vpop.f32.mrb[21].mxu1 }
 0x75e   : > { %v1724_v11 = vadd.f32 1e-06, %v1723_v10 }
 0x75f   : > { %3101 = vrsqrt.f32 %v1729_v9 }
 0x760   : > { %3103 = vrsqrt.f32 %v1724_v11  ;;  %v2922_v15 = vpop.f32.mrb[22].mxu1 }
 0x761   : > { %v1739_v17 = vadd.f32 1e-06, %v2922_v15  ;;  %v1733_v21 = vpop.f32.mrb[23].mxu1 }
 0x762   : > { %v1734_v23 = vadd.f32 1e-06, %v1733_v21 }
 0x763   : > { %3105 = vrsqrt.f32 %v1739_v17 }
 0x764   : > { %3107 = vrsqrt.f32 %v1734_v23  ;;  %v2925_v27 = vpop.f32.mrb[24].mxu1 }
 0x765   : > { %v1749_v30 = vadd.f32 1e-06, %v2925_v27  ;;  %v1743_v51 = vpop.f32.mrb[25].mxu1 }
 0x766   : > { %v1744_v52 = vadd.f32 1e-06, %v1743_v51 }
 0x767   : > { %3109 = vrsqrt.f32 %v1749_v30 }
 0x768   : > { %v2928_v53 = vpop.f32.mrb[26].mxu1  ;;  %3111 = vrsqrt.f32 %v1744_v52 }
 0x769   : > { %v3102_v54 = vpop.eup %3101  ;;  %v1759_v56 = vadd.f32 1e-06, %v2928_v53  ;;  %v1753_v57 = vpop.f32.mrb[27].mxu1 }
 0x76a   : > { %v3104_v58 = vpop.eup %3103  ;;  %v1771_v59 = vmul.f32 %v3102_v54, %v3553_v16  ;;  %v1754_v60 = vadd.f32 1e-06, %v1753_v57 }
 0x76b   : > { %v1770_v62 = vmul.f32 %v3104_v58, %v3555_v19  ;;  %3113 = vrsqrt.f32 %v1759_v56 }
 0x76c   : > { %v1786_v63 = vmul.f32 %v2618_v55, %v1771_v59  ;;  %3115 = vrsqrt.f32 %v1754_v60 }
 0x76d   : > { %v3106_v0 = vpop.eup %3105  ;;  %v1785_v1 = vmul.f32 %v2618_v55, %v1770_v62 }
 0x76e   : > { %v3108_v2 = vpop.eup %3107  ;;  %v3613_v3 = vadd.f32 %v2619_v61, %v1786_v63  ;;  %v1773_v4 = vmul.f32 %v3106_v0, %v3561_v25 }
 0x76f   : > { %v1772_v5 = vmul.f32 %v3108_v2, %v3563_v28  ;;  %v3617_v6 = vadd.f32 %v2619_v61, %v1785_v1 }
 0x770   : > { %v3620_v7 = vmul.f32 0.70710677, %v3613_v3  ;;  %v1788_v8 = vmul.f32 %v2618_v55, %v1773_v4 }
 0x771   : > { %v3623_v13 = vmul.f32 0.70710677, %v3617_v6  ;;  %v1787_v14 = vmul.f32 %v2618_v55, %v1772_v5  ;;  %v3110_v19 = vpop.eup %3109 }
 0x772   : > { %v1825_v16 = vand.u32 2147483647, %v3620_v7  ;;  %v3626_v18 = vadd.f32 %v2619_v61, %v1788_v8  ;;  %v3112_v24 = vpop.eup %3111  ;;  %v1775_v42 = vmul.f32 %v3110_v19, %v3571_v34  ;;  %vm1985_vm4 = vcmp.lt.f32.partialorder %v3620_v7, 0.0 }
 0x773   : > { %v1824_v20 = vand.u32 2147483647, %v3623_v13  ;;  %v3629_v22 = vadd.f32 %v2619_v61, %v1787_v14  ;;  %v1774_v38 = vmul.f32 %v3112_v24, %v3573_v36  ;;  %vm1984_vm5 = vcmp.lt.f32.partialorder %v3623_v13, 0.0 }
 0x774   : > { %v1833_v25 = vmul.f32 0.3275911, %v1825_v16  ;;  %v3632_v26 = vmul.f32 0.70710677, %v3626_v18  ;;  %v1937_v45 = vsub.f32 0.0, %v1825_v16  ;;  %v1790_v36 = vmul.f32 %v2618_v55, %v1775_v42 }
 0x775   : > { %v3114_v28 = vpop.eup %3113  ;;  %v1832_v29 = vmul.f32 0.3275911, %v1824_v20  ;;  %v3635_v32 = vmul.f32 0.70710677, %v3629_v22  ;;  %v1936_v48 = vsub.f32 0.0, %v1824_v20  ;;  %v1789_v9 = vmul.f32 %v2618_v55, %v1774_v38 }
 0x776   : > { %v3116_v33 = vpop.eup %3115  ;;  %v1841_v35 = vadd.f32 1.0, %v1833_v25  ;;  %v1827_v37 = vand.u32 2147483647, %v3632_v26  ;;  %v1777_v46 = vmul.f32 %v3114_v28, %v3581_v40  ;;  %v1945_v15 = vmul.f32 %v1937_v45, %v1825_v16 }
 0x777   : > { %v1840_v39 = vadd.f32 1.0, %v1832_v29  ;;  %v1826_v31 = vand.u32 2147483647, %v3635_v32  ;;  %v1776_v43 = vmul.f32 %v3116_v33, %v3583_v41  ;;  %v3643_v17 = vadd.f32 %v2619_v61, %v1789_v9 }
 0x778   : > { %3117 = vrcp.f32 %v1841_v35  ;;  %v1835_v44 = vmul.f32 0.3275911, %v1827_v37  ;;  %v1792_v34 = vmul.f32 %v2618_v55, %v1777_v46  ;;  %v1944_v41 = vmul.f32 %v1936_v48, %v1824_v20 }
 0x779   : > { %3119 = vrcp.f32 %v1840_v39  ;;  %v1834_v47 = vmul.f32 0.3275911, %v1826_v31  ;;  %v1938_v10 = vsub.f32 0.0, %v1826_v31  ;;  %v1791_v11 = vmul.f32 %v2618_v55, %v1776_v43 }
 0x77a   : > { %v1843_v49 = vadd.f32 1.0, %v1835_v44  ;;  %v1939_v21 = vsub.f32 0.0, %v1827_v37  ;;  %v3645_v23 = vadd.f32 %v2619_v61, %v1790_v36  ;;  %v3650_v27 = vmul.f32 0.70710677, %v3643_v17 }
 0x77b   : > { %v1842_v50 = vadd.f32 1.0, %v1834_v47  ;;  %v3647_v40 = vadd.f32 %v2619_v61, %v1791_v11  ;;  %v3652_v30 = vadd.f32 %v2619_v61, %v1792_v34  ;;  %v1946_v51 = vmul.f32 %v1938_v10, %v1826_v31 }
 0x77c   : > { %3121 = vrcp.f32 %v1843_v49  ;;  %v3655_v52 = vmul.f32 0.70710677, %v3645_v23  ;;  %v1954_v53 = vmul.f32 1.442695, %v1945_v15  ;;  %v1828_v54 = vand.u32 2147483647, %v3650_v27 }
 0x77d   : > { %3123 = vrcp.f32 %v1842_v50  ;;  %v3659_v55 = vmul.f32 0.70710677, %v3647_v40  ;;  %v1952_v57 = vmul.f32 1.442695, %v1944_v41  ;;  %v1947_v58 = vmul.f32 %v1939_v21, %v1827_v37 }
 0x77e   : > { %v1829_v59 = vand.u32 2147483647, %v3655_v52  ;;  %v1836_v62 = vmul.f32 0.3275911, %v1828_v54  ;;  %v3668_v63 = vmul.f32 0.70710677, %v3652_v30  ;;  %3125 = vpow2.f32 %v1954_v53 }
 0x77f   : > { %v1956_v1 = vmul.f32 1.442695, %v1946_v51  ;;  %v1830_v8 = vand.u32 2147483647, %v3659_v55  ;;  %v1958_v19 = vmul.f32 1.442695, %v1947_v58 }
 0x780   : > { %v1837_v2 = vmul.f32 0.3275911, %v1829_v59  ;;  %v1844_v5 = vadd.f32 1.0, %v1836_v62  ;;  %v1940_v20 = vsub.f32 0.0, %v1828_v54  ;;  %v1831_v33 = vand.u32 2147483647, %v3668_v63 }
 0x781   : > { %v1941_v38 = vsub.f32 0.0, %v1829_v59  ;;  %v1838_v42 = vmul.f32 0.3275911, %v1830_v8  ;;  %v1942_v45 = vsub.f32 0.0, %v1830_v8  ;;  %v3686_v41 = vmul.f32 0.5, %v3613_v3 }
 0x782   : > { %v3661_v56 = vpop.eup %3117  ;;  %v1845_v24 = vadd.f32 1.0, %v1837_v2  ;;  %3127 = vrcp.f32 %v1844_v5  ;;  %v1839_v49 = vmul.f32 0.3275911, %v1831_v33  ;;  %v1948_v10 = vmul.f32 %v1940_v20, %v1828_v54 }
 0x783   : > { %v3664_v60 = vpop.eup %3119  ;;  %v1865_v61 = vmul.f32 1.0614054, %v3661_v56  ;;  %v1846_v48 = vadd.f32 1.0, %v1838_v42  ;;  %v1949_v36 = vmul.f32 %v1941_v38, %v1829_v59  ;;  %v3695_v3 = vmul.f32 0.5, %v3617_v6 }
 0x784   : > { %v1864_v0 = vmul.f32 1.0614054, %v3664_v60  ;;  %3129 = vrcp.f32 %v1845_v24  ;;  %v1847_v34 = vadd.f32 1.0, %v1839_v49  ;;  %v1960_v62 = vmul.f32 1.442695, %v1948_v10 }
 0x785   : > { %v1873_v4 = vadd.f32 -1.4531521, %v1865_v61  ;;  %3131 = vpow2.f32 %v1952_v57  ;;  %v1950_v61 = vmul.f32 %v1942_v45, %v1830_v8  ;;  %v1943_v5 = vsub.f32 0.0, %v1831_v33 }
 0x786   : > { %v3672_v14 = vpop.eup %3121  ;;  %v1872_v16 = vadd.f32 -1.4531521, %v1864_v0  ;;  %3133 = vpow2.f32 %v1956_v1  ;;  %v1962_v0 = vmul.f32 1.442695, %v1949_v36  ;;  %vm1987_vm6 = vcmp.lt.f32.partialorder %v3632_v26, 0.0 }
 0x787   : > { %v3674_v25 = vpop.eup %3123  ;;  %v1881_v28 = vmul.f32 %v3661_v56, %v1873_v4  ;;  %v1867_v29 = vmul.f32 1.0614054, %v3672_v14  ;;  %3135 = vrcp.f32 %v1846_v48  ;;  %v1951_v45 = vmul.f32 %v1943_v5, %v1831_v33 }
 0x788   : > { %v1880_v35 = vmul.f32 %v3664_v60, %v1872_v16  ;;  %v1866_v37 = vmul.f32 1.0614054, %v3674_v25  ;;  %3137 = vpow2.f32 %v1958_v19  ;;  %v3126_v53 = vpop.eup %3125  ;;  %vm1986_vm7 = vcmp.lt.f32.partialorder %v3635_v32, 0.0 }
 0x789   : > { %v1889_v39 = vadd.f32 1.4214138, %v1881_v28  ;;  %v1875_v31 = vadd.f32 -1.4531521, %v1867_v29  ;;  %3139 = vrcp.f32 %v1847_v34  ;;  %vm1988_vm8 = vcmp.lt.f32.partialorder %v3650_v27, 0.0 }
 0x78a   : > { %v1888_v43 = vadd.f32 1.4214138, %v1880_v35  ;;  %v1874_v44 = vadd.f32 -1.4531521, %v1866_v37  ;;  %v1964_v35 = vmul.f32 1.442695, %v1950_v61  ;;  %3141 = vpow2.f32 %v1960_v62 }
 0x78b   : > { %v1897_v46 = vmul.f32 %v3661_v56, %v1889_v39  ;;  %v1883_v47 = vmul.f32 %v3672_v14, %v1875_v31  ;;  %3143 = vpow2.f32 %v1962_v0  ;;  %vm1989_vm9 = vcmp.lt.f32.partialorder %v3655_v52, 0.0 }
 0x78c   : > { %v1896_v50 = vmul.f32 %v3664_v60, %v1888_v43  ;;  %v1882_v9 = vmul.f32 %v3674_v25, %v1874_v44  ;;  %v3692_v1 = vpop.eup %3127  ;;  %3145 = vpow2.f32 %v1964_v35  ;;  %vm1990_vm10 = vcmp.lt.f32.partialorder %v3659_v55, 0.0  ;;  %v2388_v55 = vld [vmem:[%s3979_s19] sm:$0xff] }
 0x78d   : > { %v1905_v11 = vadd.f32 -0.28449672, %v1897_v46  ;;  %v1891_v15 = vadd.f32 1.4214138, %v1883_v47  ;;  %v1868_v20 = vmul.f32 1.0614054, %v3692_v1  ;;  %2965 = vmatprep.mubr.msk.f32.mxu1 %vm1020_vm3, %v2388_v55 }
 0x78e   : > { %v1904_v21 = vadd.f32 -0.28449672, %v1896_v50  ;;  %v1890_v51 = vadd.f32 1.4214138, %v1882_v9  ;;  %v3697_v16 = vpop.eup %3129  ;;  %vm1991_vm11 = vcmp.lt.f32.partialorder %v3668_v63, 0.0 }
 0x78f   : > { %v1913_v57 = vmul.f32 %v3661_v56, %v1905_v11  ;;  %v1899_v58 = vmul.f32 %v3672_v14, %v1891_v15  ;;  %v3132_v24 = vpop.eup %3131  ;;  %v1869_v6 = vmul.f32 1.0614054, %v3697_v16  ;;  %v1876_v31 = vadd.f32 -1.4531521, %v1868_v20 }
 0x790   : > { %v1912_v54 = vmul.f32 %v3664_v60, %v1904_v21  ;;  %v1898_v59 = vmul.f32 %v3674_v25, %v1890_v51  ;;  %v3134_v37 = vpop.eup %3133 }
 0x791   : > { %v1921_v2 = vadd.f32 0.2548296, %v1913_v57  ;;  %v1907_v4 = vadd.f32 -0.28449672, %v1899_v58  ;;  %v1877_v44 = vadd.f32 -1.4531521, %v1869_v6  ;;  %v3709_v48 = vpop.eup %3135 }
 0x792   : > { %v1920_v8 = vadd.f32 0.2548296, %v1912_v54  ;;  %v1906_v19 = vadd.f32 -0.28449672, %v1898_v59  ;;  %v3138_v9 = vpop.eup %3137  ;;  %v1870_v11 = vmul.f32 1.0614054, %v3709_v48 }
 0x793   : > { %v1929_v28 = vmul.f32 %v3661_v56, %v1921_v2  ;;  %v1915_v29 = vmul.f32 %v3672_v14, %v1907_v4  ;;  %v1884_v56 = vmul.f32 %v3692_v1, %v1876_v31  ;;  %v1885_v50 = vmul.f32 %v3697_v16, %v1877_v44  ;;  %v3716_v15 = vpop.eup %3139 }
 0x794   : > { %v1928_v38 = vmul.f32 %v3664_v60, %v1920_v8  ;;  %v1914_v39 = vmul.f32 %v3674_v25, %v1906_v19  ;;  %v1878_v61 = vadd.f32 -1.4531521, %v1870_v11  ;;  %v1871_v62 = vmul.f32 1.0614054, %v3716_v15 }
 0x795   : > { %v1969_v42 = vmul.f32 %v3126_v53, %v1929_v28  ;;  %v1923_v43 = vadd.f32 0.2548296, %v1915_v29  ;;  %v1892_v36 = vadd.f32 1.4214138, %v1884_v56  ;;  %v1893_v51 = vadd.f32 1.4214138, %v1885_v50  ;;  %v3142_v28 = vpop.eup %3141 }
 0x796   : > { %v1968_v46 = vmul.f32 %v3132_v24, %v1928_v38  ;;  %v1922_v47 = vadd.f32 0.2548296, %v1914_v39  ;;  %v1966_v53 = vmul.f32 1.442695, %v1951_v45  ;;  %v1886_v24 = vmul.f32 %v3709_v48, %v1878_v61  ;;  %v3144_v31 = vpop.eup %3143 }
 0x797   : > { %v1977_v49 = vsub.f32 1.0, %v1969_v42  ;;  %v1931_v60 = vmul.f32 %v3672_v14, %v1923_v43  ;;  %v1900_v14 = vmul.f32 %v3692_v1, %v1892_v36  ;;  %v1879_v35 = vadd.f32 -1.4531521, %v1871_v62  ;;  %v3146_v45 = vpop.eup %3145 }
 0x798   : > { %v1976_v10 = vsub.f32 1.0, %v1968_v46  ;;  %v1930_v33 = vmul.f32 %v3674_v25, %v1922_v47  ;;  %v1901_v25 = vmul.f32 %v3697_v16, %v1893_v51  ;;  %v1894_v39 = vadd.f32 1.4214138, %v1886_v24 }
 0x799   : > { %v1993_v34 = vsub.f32 0.0, %v1977_v49  ;;  %v1971_v21 = vmul.f32 %v3138_v9, %v1931_v60  ;;  %v1908_v5 = vadd.f32 -0.28449672, %v1900_v14  ;;  %v1810_v46 = vmul.f32 0.5, %v3629_v22 }
 0x79a   : > { %v1992_v57 = vsub.f32 0.0, %v1976_v10  ;;  %v1970_v58 = vmul.f32 %v3134_v37, %v1930_v33  ;;  %v1909_v20 = vadd.f32 -0.28449672, %v1901_v25  ;;  %v1902_v26 = vmul.f32 %v3709_v48, %v1894_v39 }
 0x79b   : > { %v2001_v54 = vsel %vm1985_vm4, %v1993_v34, %v1977_v49  ;;  %v1979_v59 = vsub.f32 1.0, %v1971_v21  ;;  %v1916_v6 = vmul.f32 %v3692_v1, %v1908_v5  ;;  %v1811_v56 = vmul.f32 0.5, %v3626_v18 }
 0x79c   : > { %v2000_v0 = vsel %vm1984_vm5, %v1992_v57, %v1976_v10  ;;  %v2009_v2 = vadd.f32 1.0, %v2001_v54  ;;  %v1978_v4 = vsub.f32 1.0, %v1970_v58  ;;  %v1917_v38 = vmul.f32 %v3697_v16, %v1909_v20 }
 0x79d   : > { %v2008_v8 = vadd.f32 1.0, %v2000_v0  ;;  %v1995_v19 = vsub.f32 0.0, %v1979_v59  ;;  %v1924_v44 = vadd.f32 0.2548296, %v1916_v6  ;;  %v1910_v9 = vadd.f32 -0.28449672, %v1902_v26 }
 0x79e   : > { %v2017_v7 = vmul.f32 %v2009_v2, %v3686_v41  ;;  %v1994_v29 = vsub.f32 0.0, %v1978_v4  ;;  %v1887_v41 = vmul.f32 %v3716_v15, %v1879_v35  ;;  %v1925_v47 = vadd.f32 0.2548296, %v1917_v38 }
 0x79f   : > { %v2016_v37 = vmul.f32 %v2008_v8, %v3695_v3  ;;  %v2003_v13 = vsel %vm1987_vm6, %v1995_v19, %v1979_v59  ;;  %v1932_v32 = vmul.f32 %v3692_v1, %v1924_v44  ;;  %3147 = vpow2.f32 %v1966_v53 }
 0x7a0   : > { %v2002_v42 = vsel %vm1986_vm7, %v1994_v29, %v1978_v4  ;;  %v2011_v43 = vadd.f32 1.0, %v2003_v13  ;;  %v1895_v49 = vadd.f32 1.4214138, %v1887_v41  ;;  %v1933_v50 = vmul.f32 %v3697_v16, %v1925_v47 }
 0x7a1   : > { %2937 = vmatprep.mubr.msk.f32.mxu0 %vm658_vm0, %v2016_v37  ;;  %v2010_v3 = vadd.f32 1.0, %v2002_v42  ;;  %v1972_v33 = vmul.f32 %v3142_v28, %v1932_v32  ;;  %v1918_v11 = vmul.f32 %v3709_v48, %v1910_v9  ;;  %v1812_v61 = vmul.f32 0.5, %v3643_v17 }
 0x7a2   : > { %2938 = vmatmul.mubr.msk.f32.vlgmr.msra.gmra.mrb[22].mxu0 %vm658_vm0, %v2017_v7  ;;  %v2019_v10 = vmul.f32 %v2011_v43, %v1811_v56  ;;  %v1903_v22 = vmul.f32 %v3716_v15, %v1895_v49  ;;  %v1973_v36 = vmul.f32 %v3144_v31, %v1933_v50  ;;  %v1813_v62 = vmul.f32 0.5, %v3645_v23 }
 0x7a3   : > { %v2018_v60 = vmul.f32 %v2010_v3, %v1810_v46  ;;  %v1980_v18 = vsub.f32 1.0, %v1972_v33  ;;  %v1926_v21 = vadd.f32 0.2548296, %v1918_v11  ;;  %v1814_v20 = vmul.f32 0.5, %v3647_v40  ;;  %v2591_v40 = vld [vmem:[%s3971_s11] ss:$0 sm:$0xff] }
 0x7a4   : > { %v1911_v34 = vadd.f32 -0.28449672, %v1903_v22  ;;  %v1981_v1 = vsub.f32 1.0, %v1973_v36  ;;  %v1815_v7 = vmul.f32 0.5, %v3652_v30  ;;  %v1358_v63 = vadd.f32 %v2591_v40, %v3551_v12  ;;  %v3772_v30 = vld [vmem:[%s3977_s17] ss:$0 sm:$0xff] }
 0x7a5   : > { %2940 = vmatprep.mubr.msk.f32.mxu0 %vm658_vm0, %v2018_v60  ;;  %v1996_v51 = vsub.f32 0.0, %v1980_v18  ;;  %v1934_v57 = vmul.f32 %v3709_v48, %v1926_v21 }
 0x7a6   : > { %2941 = vmatmul.mubr.msk.f32.gmra.mrb[24].mxu0 %vm658_vm0, %v2019_v10  ;;  %v1919_v16 = vmul.f32 %v3716_v15, %v1911_v34  ;;  %v1997_v53 = vsub.f32 0.0, %v1981_v1  ;;  %v1361_v37 = vsel %vm1020_vm3, %v1358_v63, 0.0 }
 0x7a7   : > { %v2004_v58 = vsel %vm1988_vm8, %v1996_v51, %v1980_v18  ;;  %v1974_v25 = vmul.f32 %v3146_v45, %v1934_v57  ;;  %v1362_v42 = vrot.slane %v1361_v37, 4 }
 0x7a8   : > { %v1927_v14 = vadd.f32 0.2548296, %v1919_v16  ;;  %v2012_v54 = vadd.f32 1.0, %v2004_v58  ;;  %v2005_v59 = vsel %vm1989_vm9, %v1997_v53, %v1981_v1 }
 0x7a9   : > { %v2013_v0 = vadd.f32 1.0, %v2005_v59  ;;  %v3148_v4 = vpop.eup %3147  ;;  %v1982_v27 = vsub.f32 1.0, %v1974_v25  ;;  %v1363_v56 = vadd.f32 %v1362_v42, %v1361_v37 }
 0x7aa   : > { %v1935_v2 = vmul.f32 %v3716_v15, %v1927_v14  ;;  %v2020_v5 = vmul.f32 %v2012_v54, %v1812_v61 }
 0x7ab   : > { %v2021_v8 = vmul.f32 %v2013_v0, %v1813_v62  ;;  %v1998_v48 = vsub.f32 0.0, %v1982_v27  ;;  %v1364_v22 = vrot.slane %v1363_v56, 2 }
 0x7ac   : > { %v1975_v19 = vmul.f32 %v3148_v4, %v1935_v2  ;;  %2943 = vmatprep.mubr.msk.f32.mxu0 %vm658_vm0, %v2020_v5 }
 0x7ad   : > { %2944 = vmatmul.mubr.msk.f32.gmra.mrb[26].mxu0 %vm658_vm0, %v2021_v8  ;;  %v2006_v52 = vsel %vm1990_vm10, %v1998_v48, %v1982_v27  ;;  %v3797_v16 = vadd.f32 %v1364_v22, %v1363_v56 }
 0x7ae   : > { %v1983_v17 = vsub.f32 1.0, %v1975_v19  ;;  %v2014_v23 = vadd.f32 1.0, %v2006_v52 }
 0x7af   : > { %v1366_v25 = vrot.slane %v3797_v16, 1 }
 0x7b0   : > { %v1999_v24 = vsub.f32 0.0, %v1983_v17  ;;  %v2022_v15 = vmul.f32 %v2014_v23, %v1814_v20 }
 0x7b2   : > { %v2007_v28 = vsel %vm1991_vm11, %v1999_v24, %v1983_v17  ;;  %2946 = vmatprep.mubr.msk.f32.mxu0 %vm658_vm0, %v2022_v15 }
 0x7b3   : > { %v2015_v29 = vadd.f32 1.0, %v2007_v28 }
 0x7b5   : > { %v2023_v6 = vmul.f32 %v2015_v29, %v1815_v7 }
 0x7b7   : > { %2947 = vmatmul.mubr.msk.f32.gmra.mrb[28].mxu0 %vm658_vm0, %v2023_v6  ;;  %vm3910_vm0 = vmpackc.low %vm1020_vm3, %vm1020_vm3 }
 0x875   : > { %v2939_v35 = vpop.f32.mrb[22].mxu0 }
 0x876   : > { %v2131_v13 = vadd.f32 %v2939_v35, %v3772_v30  ;;  %v2125_v38 = vpop.f32.mrb[23].mxu0 }
 0x877   : > { %v2126_v39 = vadd.f32 %v3772_v30, %v2125_v38 }
 0x878   : > { %v3777_v31 = vmul.f32 0.70710677, %v2131_v13  ;;  %v3813_v4 = vmul.f32 0.5, %v2131_v13 }
 0x879   : > { %v3779_v43 = vmul.f32 0.70710677, %v2126_v39  ;;  %v2942_v44 = vpop.f32.mrb[24].mxu0  ;;  %v3818_v17 = vmul.f32 0.5, %v2126_v39 }
 0x87a   : > { %v2181_v12 = vand.u32 2147483647, %v3777_v31  ;;  %v2141_v41 = vadd.f32 %v2942_v44, %v3772_v30  ;;  %v2135_v45 = vpop.f32.mrb[25].mxu0  ;;  %vm2341_vm12 = vcmp.lt.f32.partialorder %v3777_v31, 0.0 }
 0x87b   : > { %v2180_v46 = vand.u32 2147483647, %v3779_v43  ;;  %v3785_v3 = vadd.f32 %v3772_v30, %v2135_v45  ;;  %vm2340_vm13 = vcmp.lt.f32.partialorder %v3779_v43, 0.0 }
 0x87c   : > { %v2189_v47 = vmul.f32 0.3275911, %v2181_v12  ;;  %v3787_v26 = vmul.f32 0.70710677, %v2141_v41  ;;  %v2293_v1 = vsub.f32 0.0, %v2181_v12  ;;  %v3820_v52 = vmul.f32 0.5, %v2141_v41 }
 0x87d   : > { %v2188_v32 = vmul.f32 0.3275911, %v2180_v46  ;;  %v3790_v49 = vmul.f32 0.70710677, %v3785_v3  ;;  %v2292_v53 = vsub.f32 0.0, %v2180_v46 }
 0x87e   : > { %v2197_v60 = vadd.f32 1.0, %v2189_v47  ;;  %v2183_v50 = vand.u32 2147483647, %v3787_v26  ;;  %v2301_v54 = vmul.f32 %v2293_v1, %v2181_v12  ;;  %vm2343_vm14 = vcmp.lt.f32.partialorder %v3787_v26, 0.0 }
 0x87f   : > { %v2196_v9 = vadd.f32 1.0, %v2188_v32  ;;  %v2182_v10 = vand.u32 2147483647, %v3790_v49  ;;  %v2300_v62 = vmul.f32 %v2292_v53, %v2180_v46  ;;  %vm2342_vm15 = vcmp.lt.f32.partialorder %v3790_v49, 0.0 }
 0x880   : > { %3149 = vrcp.f32 %v2197_v60  ;;  %v2191_v33 = vmul.f32 0.3275911, %v2183_v50  ;;  %v2945_v34 = vpop.f32.mrb[26].mxu0  ;;  %v2295_v58 = vsub.f32 0.0, %v2183_v50  ;;  %v2310_v23 = vmul.f32 1.442695, %v2301_v54 }
 0x881   : > { %3151 = vrcp.f32 %v2196_v9  ;;  %v2190_v36 = vmul.f32 0.3275911, %v2182_v10  ;;  %v3795_v21 = vadd.f32 %v2945_v34, %v3772_v30  ;;  %v2145_v51 = vpop.f32.mrb[27].mxu0  ;;  %v2294_v27 = vsub.f32 0.0, %v2182_v10 }
 0x882   : > { %v2199_v11 = vadd.f32 1.0, %v2191_v33  ;;  %v3800_v57 = vadd.f32 %v3772_v30, %v2145_v51  ;;  %v2303_v5 = vmul.f32 %v2295_v58, %v2183_v50  ;;  %v2308_v29 = vmul.f32 1.442695, %v2300_v62 }
 0x883   : > { %v2198_v18 = vadd.f32 1.0, %v2190_v36  ;;  %v3803_v14 = vmul.f32 0.70710677, %v3795_v21  ;;  %v2302_v13 = vmul.f32 %v2294_v27, %v2182_v10  ;;  %v3849_v54 = vmul.f32 0.5, %v3785_v3 }
 0x884   : > { %3153 = vrcp.f32 %v2199_v11  ;;  %v3806_v61 = vmul.f32 0.70710677, %v3800_v57  ;;  %v2314_v37 = vmul.f32 1.442695, %v2303_v5 }
 0x885   : > { %3155 = vrcp.f32 %v2198_v18  ;;  %v2185_v59 = vand.u32 2147483647, %v3803_v14  ;;  %v2312_v9 = vmul.f32 1.442695, %v2302_v13  ;;  %vm2345_vm1 = vcmp.lt.f32.partialorder %v3803_v14, 0.0 }
 0x886   : > { %v2184_v0 = vand.u32 2147483647, %v3806_v61  ;;  %vm2344_vm2 = vcmp.lt.f32.partialorder %v3806_v61, 0.0 }
 0x887   : > { %v2193_v8 = vmul.f32 0.3275911, %v2185_v59  ;;  %v2297_v44 = vsub.f32 0.0, %v2185_v59 }
 0x888   : > { %v2192_v20 = vmul.f32 0.3275911, %v2184_v0  ;;  %v2296_v45 = vsub.f32 0.0, %v2184_v0 }
 0x889   : > { %v2201_v15 = vadd.f32 1.0, %v2193_v8  ;;  %v2305_v22 = vmul.f32 %v2297_v44, %v2185_v59 }
 0x88a   : > { %v3811_v2 = vpop.eup %3149  ;;  %v2948_v28 = vpop.f32.mrb[28].mxu0  ;;  %v2200_v6 = vadd.f32 1.0, %v2192_v20  ;;  %v2304_v18 = vmul.f32 %v2296_v45, %v2184_v0 }
 0x88b   : > { %v3815_v19 = vpop.eup %3151  ;;  %v2221_v48 = vmul.f32 1.0614054, %v3811_v2  ;;  %v3824_v55 = vadd.f32 %v2948_v28, %v3772_v30  ;;  %v2155_v40 = vpop.f32.mrb[29].mxu0  ;;  %3157 = vrcp.f32 %v2201_v15  ;;  %v2318_v27 = vmul.f32 1.442695, %v2305_v22 }
 0x88c   : > { %v2220_v24 = vmul.f32 1.0614054, %v3815_v19  ;;  %3159 = vrcp.f32 %v2200_v6  ;;  %v3835_v46 = vadd.f32 %v3772_v30, %v2155_v40 }
 0x88d   : > { %v2229_v7 = vadd.f32 -1.4531521, %v2221_v48  ;;  %3161 = vpow2.f32 %v2310_v23  ;;  %v3838_v32 = vmul.f32 0.70710677, %v3824_v55  ;;  %v2316_v23 = vmul.f32 1.442695, %v2304_v18 }
 0x88e   : > { %v3826_v63 = vpop.eup %3153  ;;  %v2228_v35 = vadd.f32 -1.4531521, %v2220_v24  ;;  %3163 = vpow2.f32 %v2308_v29  ;;  %v3846_v34 = vmul.f32 0.70710677, %v3835_v46  ;;  %v3866_v29 = vadd.f32 %v1366_v25, %v3797_v16 }
 0x88f   : > { %v3828_v38 = vpop.eup %3155  ;;  %v2237_v39 = vmul.f32 %v3811_v2, %v2229_v7  ;;  %v2223_v42 = vmul.f32 1.0614054, %v3826_v63  ;;  %v2187_v36 = vand.u32 2147483647, %v3838_v32  ;;  %3165 = vpow2.f32 %v2314_v37 }
 0x890   : > { %v2236_v12 = vmul.f32 %v3815_v19, %v2228_v35  ;;  %v2222_v41 = vmul.f32 1.0614054, %v3828_v38  ;;  %3167 = vpow2.f32 %v2312_v9  ;;  %v3858_v24 = vand.u32 2147483647, %v3846_v34 }
 0x891   : > { %v2245_v47 = vadd.f32 1.4214138, %v2237_v39  ;;  %v2231_v56 = vadd.f32 -1.4531521, %v2223_v42  ;;  %v2195_v53 = vmul.f32 0.3275911, %v2187_v36 }
 0x892   : > { %v2244_v60 = vadd.f32 1.4214138, %v2236_v12  ;;  %v2230_v50 = vadd.f32 -1.4531521, %v2222_v41  ;;  %v2299_v44 = vsub.f32 0.0, %v2187_v36  ;;  %vm2347_vm4 = vcmp.lt.f32.partialorder %v3838_v32, 0.0 }
 0x893   : > { %v2253_v10 = vmul.f32 %v3811_v2, %v2245_v47  ;;  %v2239_v33 = vmul.f32 %v3826_v63, %v2231_v56  ;;  %v2203_v8 = vadd.f32 1.0, %v2195_v53  ;;  %v2194_v45 = vmul.f32 0.3275911, %v3858_v24 }
 0x894   : > { %v2252_v30 = vmul.f32 %v3815_v19, %v2244_v60  ;;  %v2238_v11 = vmul.f32 %v3828_v38, %v2230_v50  ;;  %vm2346_vm5 = vcmp.lt.f32.partialorder %v3846_v34, 0.0 }
 0x895   : > { %v2261_v1 = vadd.f32 -0.28449672, %v2253_v10  ;;  %v2247_v51 = vadd.f32 1.4214138, %v2239_v33  ;;  %v3853_v0 = vpop.eup %3157  ;;  %3169 = vrcp.f32 %v2203_v8  ;;  %v2202_v10 = vadd.f32 1.0, %v2194_v45 }
 0x896   : > { %v2260_v58 = vadd.f32 -0.28449672, %v2252_v30  ;;  %v2246_v62 = vadd.f32 1.4214138, %v2238_v11  ;;  %v3860_v3 = vpop.eup %3159  ;;  %v2225_v7 = vmul.f32 1.0614054, %v3853_v0  ;;  %3171 = vpow2.f32 %v2318_v27 }
 0x897   : > { %v2269_v59 = vmul.f32 %v3811_v2, %v2261_v1  ;;  %v2255_v5 = vmul.f32 %v3826_v63, %v2247_v51  ;;  %v2224_v35 = vmul.f32 1.0614054, %v3860_v3  ;;  %v3162_v37 = vpop.eup %3161  ;;  %v2307_v11 = vmul.f32 %v2299_v44, %v2187_v36 }
 0x898   : > { %v2268_v48 = vmul.f32 %v3815_v19, %v2260_v58  ;;  %v2254_v20 = vmul.f32 %v3828_v38, %v2246_v62  ;;  %v2233_v42 = vadd.f32 -1.4531521, %v2225_v7  ;;  %v3164_v12 = vpop.eup %3163  ;;  %3173 = vrcp.f32 %v2202_v10 }
 0x899   : > { %v2277_v15 = vadd.f32 0.2548296, %v2269_v59  ;;  %v2263_v28 = vadd.f32 -0.28449672, %v2255_v5  ;;  %v2232_v25 = vadd.f32 -1.4531521, %v2224_v35  ;;  %v3166_v33 = vpop.eup %3165  ;;  %3175 = vpow2.f32 %v2316_v23 }
 0x89a   : > { %v2276_v6 = vadd.f32 0.2548296, %v2268_v48  ;;  %v2262_v40 = vadd.f32 -0.28449672, %v2254_v20  ;;  %v2241_v60 = vmul.f32 %v3853_v0, %v2233_v42  ;;  %v3168_v18 = vpop.eup %3167  ;;  %v2322_v20 = vmul.f32 1.442695, %v2307_v11 }
 0x89b   : > { %v2285_v13 = vmul.f32 %v3811_v2, %v2277_v15  ;;  %v2271_v39 = vmul.f32 %v3826_v63, %v2263_v28  ;;  %v2240_v9 = vmul.f32 %v3860_v3, %v2232_v25  ;;  %v2298_v42 = vsub.f32 0.0, %v3858_v24 }
 0x89c   : > { %v2284_v41 = vmul.f32 %v3815_v19, %v2276_v6  ;;  %v2270_v16 = vmul.f32 %v3828_v38, %v2262_v40  ;;  %v2249_v30 = vadd.f32 1.4214138, %v2241_v60  ;;  %3177 = vpow2.f32 %v2322_v20 }
 0x89d   : > { %v2325_v47 = vmul.f32 %v3162_v37, %v2285_v13  ;;  %v2279_v56 = vadd.f32 0.2548296, %v2271_v39  ;;  %v2248_v53 = vadd.f32 1.4214138, %v2240_v9  ;;  %v2306_v10 = vmul.f32 %v2298_v42, %v3858_v24 }
 0x89e   : > { %v2324_v2 = vmul.f32 %v3164_v12, %v2284_v41  ;;  %v2278_v50 = vadd.f32 0.2548296, %v2270_v16  ;;  %v2257_v59 = vmul.f32 %v3853_v0, %v2249_v30 }
 0x89f   : > { %v2333_v22 = vsub.f32 1.0, %v2325_v47  ;;  %v2287_v19 = vmul.f32 %v3826_v63, %v2279_v56  ;;  %v2256_v8 = vmul.f32 %v3860_v3, %v2248_v53  ;;  %v3884_v63 = vpop.eup %3169  ;;  %v2320_v53 = vmul.f32 1.442695, %v2306_v10 }
 0x8a0   : > { %v2332_v1 = vsub.f32 1.0, %v2324_v2  ;;  %v2286_v51 = vmul.f32 %v3828_v38, %v2278_v50  ;;  %v2265_v38 = vadd.f32 -0.28449672, %v2257_v59  ;;  %v2227_v37 = vmul.f32 1.0614054, %v3884_v63  ;;  %v3172_v44 = vpop.eup %3171 }
 0x8a1   : > { %v2349_v58 = vsub.f32 0.0, %v2333_v22  ;;  %v2327_v62 = vmul.f32 %v3166_v33, %v2287_v19  ;;  %v2264_v23 = vadd.f32 -0.28449672, %v2256_v8  ;;  %3179 = vpow2.f32 %v2320_v53 }
 0x8a2   : > { %v2348_v5 = vsub.f32 0.0, %v2332_v1  ;;  %v2326_v27 = vmul.f32 %v3168_v18, %v2286_v51  ;;  %v2273_v35 = vmul.f32 %v3853_v0, %v2265_v38  ;;  %v2235_v16 = vadd.f32 -1.4531521, %v2227_v37 }
 0x8a3   : > { %v2357_v36 = vsel %vm2341_vm12, %v2349_v58, %v2333_v22  ;;  %v2335_v48 = vsub.f32 1.0, %v2327_v62  ;;  %v2272_v31 = vmul.f32 %v3860_v3, %v2264_v23  ;;  %v2169_v38 = vmul.f32 0.5, %v3795_v21 }
 0x8a4   : > { %v2365_v15 = vadd.f32 1.0, %v2357_v36  ;;  %v2356_v28 = vsel %vm2340_vm13, %v2348_v5, %v2332_v1  ;;  %v2334_v7 = vsub.f32 1.0, %v2326_v27  ;;  %v2281_v41 = vadd.f32 0.2548296, %v2273_v35 }
 0x8a5   : > { %v2364_v6 = vadd.f32 1.0, %v2356_v28  ;;  %v2351_v40 = vsub.f32 0.0, %v2335_v48  ;;  %v2243_v50 = vmul.f32 %v3884_v63, %v2235_v16  ;;  %v2168_v28 = vmul.f32 0.5, %v3800_v57 }
 0x8a6   : > { %v2373_v13 = vmul.f32 %v2365_v15, %v3813_v4  ;;  %v2350_v39 = vsub.f32 0.0, %v2334_v7  ;;  %v2280_v4 = vadd.f32 0.2548296, %v2272_v31  ;;  %v2289_v2 = vmul.f32 %v3853_v0, %v2281_v41 }
 0x8a7   : > { %v2372_v12 = vmul.f32 %v2364_v6, %v3818_v17  ;;  %v2359_v43 = vsel %vm2343_vm14, %v2351_v40, %v2335_v48  ;;  %v3174_v17 = vpop.eup %3173  ;;  %v2251_v19 = vadd.f32 1.4214138, %v2243_v50  ;;  %v2170_v50 = vmul.f32 0.5, %v3835_v46 }
 0x8a8   : > { %v2381_v25 = vmul.f32 %v2373_v13, %v3866_v29  ;;  %v2367_v45 = vadd.f32 1.0, %v2359_v43  ;;  %v2358_v47 = vsel %vm2342_vm15, %v2350_v39, %v2334_v7  ;;  %v2288_v9 = vmul.f32 %v3860_v3, %v2280_v4  ;;  %v3176_v33 = vpop.eup %3175 }
 0x8a9   : > { %v2380_v56 = vmul.f32 %v2372_v12, %v3866_v29  ;;  %v2366_v60 = vadd.f32 1.0, %v2358_v47  ;;  %v2329_v49 = vmul.f32 %v3172_v44, %v2289_v2  ;;  %v2226_v30 = vmul.f32 1.0614054, %v3174_v17  ;;  %v3178_v37 = vpop.eup %3177 }
 0x8aa   : > { %v2375_v26 = vmul.f32 %v2367_v45, %v3820_v52  ;;  %v2328_v18 = vmul.f32 %v3176_v33, %v2288_v9  ;;  %v2259_v1 = vmul.f32 %v3884_v63, %v2251_v19  ;;  %v2389_v9 = vld [vmem:[%s3979_s19 + $0x8] sm:$0xff] }
 0x8ab   : > { %v2374_v22 = vmul.f32 %v2366_v60, %v3849_v54  ;;  %v3062_v52 = vpack.c.bf16 %v2381_v25, %v2380_v56  ;;  %v2337_v24 = vsub.f32 1.0, %v2329_v49  ;;  %v2234_v54 = vadd.f32 -1.4531521, %v2226_v30 }
 0x8ac   : > { %v2383_v0 = vmul.f32 %v2375_v26, %v3866_v29  ;;  %v2336_v51 = vsub.f32 1.0, %v2328_v18  ;;  %v2267_v62 = vadd.f32 -0.28449672, %v2259_v1  ;;  %v2171_v25 = vmul.f32 0.5, %v3824_v55 }
 0x8ad   : > { %v2382_v3 = vmul.f32 %v2374_v22, %v3866_v29  ;;  %3064 = vmatprep.subr.msk.bf16.mxu1 %vm3910_vm0, %v3062_v52  ;;  %v2353_v58 = vsub.f32 0.0, %v2337_v24  ;;  %v2242_v59 = vmul.f32 %v3174_v17, %v2234_v54 }
 0x8ae   : > { %3067 = vmatpush3.bf16.xpose.msk.msra.mxu1 %vm3910_vm0, %v3062_v52  ;;  %v2352_v27 = vsub.f32 0.0, %v2336_v51  ;;  %v2275_v36 = vmul.f32 %v3884_v63, %v2267_v62 }
 0x8af   : > { %v3068_v5 = vpack.c.bf16 %v2383_v0, %v2382_v3  ;;  %v2361_v8 = vsel %vm2345_vm1, %v2353_v58, %v2337_v24  ;;  %v2250_v48 = vadd.f32 1.4214138, %v2242_v59 }
 0x8b0   : > { %v2369_v20 = vadd.f32 1.0, %v2361_v8  ;;  %v2360_v15 = vsel %vm2344_vm2, %v2352_v27, %v2336_v51  ;;  %v2283_v23 = vadd.f32 0.2548296, %v2275_v36 }
 0x8b1   : > { %3070 = vmatprep.subr.msk.bf16.mxu1 %vm3910_vm0, %v3068_v5  ;;  %v2368_v7 = vadd.f32 1.0, %v2360_v15  ;;  %v2258_v14 = vmul.f32 %v3174_v17, %v2250_v48 }
 0x8b2   : > { %v2377_v6 = vmul.f32 %v2369_v20, %v2169_v38  ;;  %v2291_v61 = vmul.f32 %v3884_v63, %v2283_v23  ;;  %v3180_v63 = vpop.eup %3179 }
 0x8b3   : > { %v2376_v40 = vmul.f32 %v2368_v7, %v2168_v28  ;;  %v2266_v35 = vadd.f32 -0.28449672, %v2258_v14 }
 0x8b4   : > { %v2385_v13 = vmul.f32 %v2377_v6, %v3866_v29  ;;  %v2331_v31 = vmul.f32 %v3178_v37, %v2291_v61 }
 0x8b5   : > { %v2384_v39 = vmul.f32 %v2376_v40, %v3866_v29  ;;  %v2274_v21 = vmul.f32 %v3174_v17, %v2266_v35 }
 0x8b6   : > { %3073 = vmatpush3.bf16.xpose.msk.msra.mxu1 %vm3910_vm0, %v3068_v5  ;;  %v2339_v42 = vsub.f32 1.0, %v2331_v31 }
 0x8b7   : > { %v2282_v57 = vadd.f32 0.2548296, %v2274_v21  ;;  %v3074_v44 = vpack.c.bf16 %v2385_v13, %v2384_v39 }
 0x8b8   : > { %v2355_v12 = vsub.f32 0.0, %v2339_v42 }
 0x8b9   : > { %v2290_v43 = vmul.f32 %v3174_v17, %v2282_v57  ;;  %3076 = vmatprep.subr.msk.bf16.mxu1 %vm3910_vm0, %v3074_v44 }
 0x8ba   : > { %v2363_v41 = vsel %vm2347_vm4, %v2355_v12, %v2339_v42 }
 0x8bb   : > { %v2330_v16 = vmul.f32 %v3180_v63, %v2290_v43  ;;  %v2371_v45 = vadd.f32 1.0, %v2363_v41 }
 0x8bd   : > { %v2338_v47 = vsub.f32 1.0, %v2330_v16  ;;  %v2379_v4 = vmul.f32 %v2371_v45, %v2171_v25 }
 0x8be   : > { %3079 = vmatpush3.bf16.xpose.msk.msra.mxu1 %vm3910_vm0, %v3074_v44 }
 0x8bf   : > { %v2354_v56 = vsub.f32 0.0, %v2338_v47  ;;  %v2387_v60 = vmul.f32 %v2379_v4, %v3866_v29 }
 0x8c1   : > { %v2362_v2 = vsel %vm2346_vm5, %v2354_v56, %v2338_v47 }
 0x8c2   : > { %v2370_v32 = vadd.f32 1.0, %v2362_v2 }
 0x8c4   : > { %v2378_v17 = vmul.f32 %v2370_v32, %v2170_v50 }
 0x8c6   : > { %v2386_v26 = vmul.f32 %v2378_v17, %v3866_v29 }
 0x8c8   : > { %v3080_v55 = vpack.c.bf16 %v2387_v60, %v2386_v26 }
 0x8ca   : > { %3082 = vmatprep.subr.msk.bf16.mxu1 %vm3910_vm0, %v3080_v55 }
 0x8cb   : > { %3085 = vmatpush3.bf16.xpose.msk.msra.mxu1 %vm3910_vm0, %v3080_v55 }
 0x8d2   : > { %2966 = vmatmul.mubr.msk.f32.vlgmr.msra.gmra.mrb[28].mxu1 %vm1020_vm3, %v2389_v9 }
 0x9a5   : > { %v2967_v46 = vpop.f32.mrb[28].mxu1 }
 0x9a6   : > { %2496 = vst.msk [vmem:[%s629_s25 + $0x8] sm:$0xff] %vm1020_vm3, %v2967_v46  ;;  %v2486_v34 = vpop.f32.mrb[29].mxu1 }
 0x9a7   : > { %2495 = vst.msk [vmem:[%s629_s25] sm:$0xff] %vm1020_vm3, %v2486_v34 }
 0x9a8 PF: > { %s30_s1 = sadd.s32 1, %s3187_s1  }
 0x9a9   : > { %p27_p4 = scmp.ge.s32.totalorder %s30_s1, 4  }
 0x9ab   :  { %29 = sbr.rel (!%p27_p4) target bundleno = 6 (0x6), region = 130 }

</bundles_post_ra>
